<compile_context>
chip_gen: v5e
topology: v5e:2x2
jax: 0.10.0
libtpu: 0.0.40
codegen_flags: <defaults>
</compile_context>

<pallas_src>
import jax
import jax.numpy as jnp
import numpy as np
from jax.experimental import pallas as pl
from jax.experimental.pallas import tpu as pltpu


def _round_up(x, m):
    return ((x + m - 1) // m) * m


def _vmem_limit_bytes():
    # v5e/v6e have 128 MiB physical VMEM -> allow 96 MiB; v7x has only 64 MiB -> 48 MiB.
    try:
        kind = jax.devices()[0].device_kind.lower()
    except Exception:
        kind = ""
    if "v5" in kind or "v6" in kind:
        return 96 * 1024 * 1024
    return 48 * 1024 * 1024


# ---------------------------------------------------------------------------
# Stage A: pool (1x1 conv) -> channel-major flatten -> Linear -> ReLU   (one shot)
# ---------------------------------------------------------------------------

def pool_fc1_kernel(fea_ref, pw_ref, pb_ref, w1_ref, b1_ref, h_ref, p_ref):
    # fea_ref : (N_pad, c3, S)   bf16
    # pw_ref  : (8, c3)          bf16
    # pb_ref  : (8, 1)           f32
    # w1_ref  : (8, S, H)        bf16   cls_w1 reshaped: flat row o*S+s -> [o, s, :]
    # b1_ref  : (1, H)           f32
    # h_ref   : (N_pad, H)       bf16   output: hidden activations
    # p_ref   : (N_pad*8, S)     f32    scratch; row n*8+o holds pooled[n, o, :]
    #                                   (f32 so the strided sublane gather stays unpacked)
    n_pad = fea_ref.shape[0]

    # 1x1 "pool" conv: per-batch-row dots are tiny ((8,c3)@(c3,S)); lane dim = spatial.
    for n in range(n_pad):
        p = (jnp.dot(pw_ref[...], fea_ref[n], preferred_element_type=jnp.float32)
             + pb_ref[...])                                   # (8, S) f32
        p_ref[n * 8:(n + 1) * 8, :] = p

    # First Linear batched over the whole padded batch (M = n_pad), accumulated over the
    # 8 pool channels: PyTorch's NCHW channel-major .view flatten is folded into the
    # host-side (8, S, H) weight reshape, so no in-kernel relayout and no M=1 matmuls.
    acc = b1_ref[...]                                         # (1, H) f32, broadcasts
    for o in range(8):
        p_o = p_ref[pl.ds(o, n_pad, stride=8), :]             # (n_pad, S) rows n*8+o
        acc = acc + jnp.dot(p_o.astype(w1_ref.dtype), w1_ref[o],
                            preferred_element_type=jnp.float32)
    h_ref[...] = jnp.maximum(acc, 0.0).astype(h_ref.dtype)    # bf16 hidden, stored once


# ---------------------------------------------------------------------------
# Stage B: second Linear, w2 streamed tile-by-tile (parallel grid axis)
# ---------------------------------------------------------------------------

def fc2_kernel(h_ref, w2_ref, b2_ref, out_ref):
    # h_ref  : (N_pad, H)  bf16   (grid-invariant)
    # w2_ref : (H, tO)     bf16   (streamed, lane-dense)
    # b2_ref : (1, tO)     f32
    out_ref[...] = (jnp.dot(h_ref[...], w2_ref[...], preferred_element_type=jnp.float32)
                    + b2_ref[...]).astype(out_ref.dtype)


def parsing_head(fea, params, cls_dim, out_tile=512):
    """fea: (N, c3, H32, W32) f32 -> group_cls: (N, *cls_dim) f32."""
    N, c3, H32, W32 = fea.shape
    S = H32 * W32
    total_dim = int(np.prod(cls_dim))
    hidden = params["cls_w1"].shape[1]
    assert params["cls_w1"].shape[0] == 8 * S, "cls_w1 rows must equal 8*(H/32)*(W/32)"

    # Activations: pure reshape of NCHW (no transpose), cast to bf16 (item 3).
    fea3 = fea.reshape(N, c3, S).astype(jnp.bfloat16)
    n_pad = max(8, _round_up(N, 8))
    if n_pad != N:
        fea3 = jnp.pad(fea3, ((0, n_pad - N), (0, 0), (0, 0)))

    pool_w = params["pool_w"].astype(jnp.bfloat16)                   # (8, c3)
    pool_b = params["pool_b"].astype(jnp.float32)                    # (8, 1)
    # NOTE: this (8, S, H) reshape assumes cls_w1 rows follow PyTorch's NCHW channel-major
    # flatten (row index = o * S + s); weights exported in a different order would be wrong.
    w1_3d = params["cls_w1"].astype(jnp.bfloat16).reshape(8, S, hidden)
    b1 = params["cls_b1"].astype(jnp.float32).reshape(1, hidden)
    w2 = params["cls_w2"].astype(jnp.bfloat16)                       # (H, total_dim)
    b2 = params["cls_b2"].astype(jnp.float32).reshape(1, total_dim)

    # Item 4: pad the output dim UP to a multiple of the tile (lane-dense, few grid steps).
    t_o = out_tile
    o_pad = _round_up(total_dim, t_o)
    if o_pad != total_dim:
        w2 = jnp.pad(w2, ((0, 0), (0, o_pad - total_dim)))
        b2 = jnp.pad(b2, ((0, 0), (0, o_pad - total_dim)))

    vmem_limit = _vmem_limit_bytes()

    # ---- Stage A: h = relu(Linear1(flatten(pool(fea)))) ---------------------------------
    # Grid-invariant big inputs are single-buffered (item 2): no point double-buffering
    # blocks whose index_map never changes.
    h = pl.pallas_call(
        pool_fc1_kernel,
        out_shape=jax.ShapeDtypeStruct((n_pad, hidden), jnp.bfloat16),
        grid=(1,),
        in_specs=[
            pl.BlockSpec((n_pad, c3, S), lambda i: (0, 0, 0),
                         pipeline_mode=pl.Buffered(1)),              # fea (invariant)
            pl.BlockSpec((8, c3), lambda i: (0, 0)),                 # pool_w
            pl.BlockSpec((8, 1), lambda i: (0, 0)),                  # pool_b
            pl.BlockSpec((8, S, hidden), lambda i: (0, 0, 0),
                         pipeline_mode=pl.Buffered(1)),              # cls_w1 (invariant)
            pl.BlockSpec((1, hidden), lambda i: (0, 0)),             # cls_b1
        ],
        out_specs=pl.BlockSpec((n_pad, hidden), lambda i: (0, 0)),
        scratch_shapes=[pltpu.VMEM((n_pad * 8, S), jnp.float32)],    # pooled activations
        compiler_params=pltpu.CompilerParams(
            dimension_semantics=("arbitrary",),
            vmem_limit_bytes=vmem_limit,
        ),
    )(fea3, pool_w, pool_b, w1_3d, b1)

    # ---- Stage B: out = h @ w2 + b2, w2 streamed; output-tile axis is independent -------
    # "parallel" lets v7x's two TensorCores share the dominant w2 stream (item 5).
    out = pl.pallas_call(
        fc2_kernel,
        out_shape=jax.ShapeDtypeStruct((n_pad, o_pad), jnp.float32),
        grid=(o_pad // t_o,),
        in_specs=[
            pl.BlockSpec((n_pad, hidden), lambda j: (0, 0)),         # h (invariant, tiny)
            pl.BlockSpec((hidden, t_o), lambda j: (0, j)),           # cls_w2 (streamed)
            pl.BlockSpec((1, t_o), lambda j: (0, j)),                # cls_b2 (streamed)
        ],
        out_specs=pl.BlockSpec((n_pad, t_o), lambda j: (0, j)),
        compiler_params=pltpu.CompilerParams(
            dimension_semantics=("parallel",),
            vmem_limit_bytes=vmem_limit,
        ),
    )(h, w2, b2)

    # Padded batch rows / padded output columns are dropped here.
    return out[:N, :total_dim].reshape(N, *cls_dim)


# ---------------------------------------------------------------------------
# parsingNet (use_aux=False) forward
# ---------------------------------------------------------------------------

def synthetic_backbone(x, params):
    """Stand-in for build_backbone: returns (x2: c1@/8, x3: c2@/16, fea: c3@/32)."""
    def down(t, f):
        n, c, hh, ww = t.shape
        return t.reshape(n, c, hh // f, f, ww // f, f).mean(axis=(3, 5))

    x8, x16, x32 = down(x, 8), down(x, 16), down(x, 32)
    x2 = jnp.einsum("nchw,co->nohw", x8, params["proj1"])
    x3 = jnp.einsum("nchw,co->nohw", x16, params["proj2"])
    fea = jnp.einsum("nchw,co->nohw", x32, params["proj3"])
    return x2, x3, fea


def parsing_net_forward(x, params, cls_dim):
    # x: (N, Cin, H, W)  NCHW, float32
    _x2, _x3, fea = synthetic_backbone(x, params)   # fea: (N, c3, H/32, W/32)
    return parsing_head(fea, params, cls_dim)


def head_reference(fea, params, cls_dim):
    """Pure-JAX f32 reference of the head (matches the PyTorch module's math)."""
    N = fea.shape[0]
    total_dim = int(np.prod(cls_dim))
    hp = jax.lax.Precision.HIGHEST
    pooled = jnp.einsum("oc,nchw->nohw", params["pool_w"], fea, precision=hp)
    pooled = pooled + params["pool_b"].reshape(1, 8, 1, 1)
    flat = pooled.reshape(N, -1)                                  # NCHW channel-major .view
    h1 = jnp.maximum(
        jnp.dot(flat, params["cls_w1"].astype(jnp.float32), precision=hp)
        + params["cls_b1"], 0.0)
    out = (jnp.dot(h1, params["cls_w2"].astype(jnp.float32), precision=hp)
           + params["cls_b2"])
    return out[:, :total_dim].reshape(N, *cls_dim)


# ---------------------------------------------------------------------------
# Deterministic parameter construction (shapes from parsingNet.__init__)
# ---------------------------------------------------------------------------

def make_params(key, cin, c1, c2, c3, d_in, total_dim, hidden=2048):
    ks = jax.random.split(key, 8)
    # pool_w stored as f32 values that are exactly representable in bf16, so the in-kernel
    # bf16 cast is lossless and the f32 reference uses identical numbers.
    pool_w = (jax.random.normal(ks[3], (8, c3), jnp.float32) * 0.05
              ).astype(jnp.bfloat16).astype(jnp.float32)
    return {
        # synthetic backbone projections
        "proj1": jax.random.normal(ks[0], (cin, c1), jnp.float32) * 0.1,
        "proj2": jax.random.normal(ks[1], (cin, c2), jnp.float32) * 0.1,
        "proj3": jax.random.normal(ks[2], (cin, c3), jnp.float32) * 0.1,
        # self.pool = Conv2d(c3, 8, 1): weight (8, c3, 1, 1) stored as (8, c3)
        "pool_w": pool_w,
        "pool_b": jnp.zeros((8, 1), jnp.float32),
        # self.cls = Linear(d_in, 2048) -> ReLU -> Linear(2048, total_dim)
        # (stored transposed as (in, out); real_init_weights: Linear ~ N(0, 0.01));
        # large weights kept in bf16 (inference precision), biases in f32.
        "cls_w1": (jax.random.normal(ks[4], (d_in, hidden), jnp.float32) * 0.01
                   ).astype(jnp.bfloat16),
        "cls_b1": jnp.zeros((1, hidden), jnp.float32),
        "cls_w2": (jax.random.normal(ks[5], (hidden, total_dim), jnp.float32) * 0.01
                   ).astype(jnp.bfloat16),
        "cls_b2": jnp.zeros((1, total_dim), jnp.float32),
    }


if __name__ == "__main__":
    # Small configuration consistent with the module:
    #   datasets: input_size=(64, 64), griding_num=7, num_per_lane=4,
    #             num_lanes=2, use_aux=False
    #   network:  out_channel=(16, 32, 64)
    w, h = 64, 64
    griding_num, num_per_lane, num_lanes = 7, 4, 2
    cls_dim = (griding_num + 1, num_per_lane, num_lanes)
    total_dim = int(np.prod(cls_dim))               # 64
    c1, c2, c3 = 16, 32, 64
    d_in = 8 * (h // 32) * (w // 32)                # 32

    key = jax.random.PRNGKey(0)
    kx, kp = jax.random.split(key)
    x = jax.random.normal(kx, (2, 3, h, w), jnp.float32)   # NCHW image, batch=2
    params = make_params(kp, 3, c1, c2, c3, d_in, total_dim)

    out = jax.block_until_ready(parsing_net_forward(x, params, cls_dim))
    assert out.shape == (2, *cls_dim), out.shape
    assert bool(jnp.all(jnp.isfinite(out)))

    # Sanity check against a pure-JAX f32 reference (bf16 weights/activations in the
    # kernel path -> loose tolerance; intentional inference-precision choice).
    _x2, _x3, fea = synthetic_backbone(x, params)
    ref = jax.block_until_ready(head_reference(fea, params, cls_dim))
    diff = float(jnp.max(jnp.abs(out - ref)))
    scale = float(jnp.max(jnp.abs(ref))) + 1e-12
    assert diff <= 0.08 * scale + 1e-6, (diff, scale)

    print("KERNEL_OK")
</pallas_src>

<mosaic_0001>
module attributes {stable_mosaic.version = 11 : i64} {
  func.func @pool_fc1_kernel(%arg0: i32, %arg1: memref<8x64x4xbf16, #tpu.memory_space<vmem>>, %arg2: memref<8x64xbf16, #tpu.memory_space<vmem>>, %arg3: memref<8x1xf32, #tpu.memory_space<vmem>>, %arg4: memref<8x4x2048xbf16, #tpu.memory_space<vmem>>, %arg5: memref<1x2048xf32, #tpu.memory_space<vmem>>, %arg6: memref<8x2048xbf16, #tpu.memory_space<vmem>>, %arg7: memref<64x4xf32, #tpu.memory_space<vmem>>) attributes {dimension_semantics = [#tpu.dimension_semantics<arbitrary>], iteration_bounds = array<i64: 1>, scalar_prefetch = 0 : i64, scratch_operands = 1 : i64, tpu.core_type = #tpu.core_type<tc>, window_params = [{pipeline_mode = #tpu.pipeline_mode<synchronous>, transform_indices = @transform_0, window_bounds = array<i64: 8, 64, 4>}, {pipeline_mode = #tpu.pipeline_mode<synchronous>, transform_indices = @transform_1, window_bounds = array<i64: 8, 64>}, {pipeline_mode = #tpu.pipeline_mode<synchronous>, transform_indices = @transform_2, window_bounds = array<i64: 8, 1>}, {pipeline_mode = #tpu.pipeline_mode<synchronous>, transform_indices = @transform_3, window_bounds = array<i64: 8, 4, 2048>}, {pipeline_mode = #tpu.pipeline_mode<synchronous>, transform_indices = @transform_4, window_bounds = array<i64: 1, 2048>}, {pipeline_mode = #tpu.pipeline_mode<synchronous>, transform_indices = @transform_5, window_bounds = array<i64: 8, 2048>}]} {
    %c0 = arith.constant 0 : index
    %c0_0 = arith.constant 0 : index
    %0 = vector.load %arg2[%c0, %c0_0] : memref<8x64xbf16, #tpu.memory_space<vmem>>, vector<8x64xbf16>
    %c0_1 = arith.constant 0 : index
    %c0_2 = arith.constant 0 : index
    %c0_3 = arith.constant 0 : index
    %1 = vector.load %arg1[%c0_1, %c0_2, %c0_3] : memref<8x64x4xbf16, #tpu.memory_space<vmem>>, vector<1x64x4xbf16>
    %2 = vector.shape_cast %1 : vector<1x64x4xbf16> to vector<64x4xbf16>
    %cst = arith.constant dense<0.000000e+00> : vector<8x4xf32>
    %3 = tpu.matmul %0, %2, %cst {dimension_numbers = #tpu.dot_dimension_numbers<[1], [0], [0], [1], [0, 0, 1, 1], [], []>} : vector<8x64xbf16>, vector<64x4xbf16>, vector<8x4xf32> -> vector<8x4xf32>
    %c0_4 = arith.constant 0 : index
    %c0_5 = arith.constant 0 : index
    %4 = vector.load %arg3[%c0_4, %c0_5] : memref<8x1xf32, #tpu.memory_space<vmem>>, vector<8x1xf32>
    %5 = vector.broadcast %4 : vector<8x1xf32> to vector<8x4xf32>
    %6 = arith.addf %3, %5 : vector<8x4xf32>
    %c0_6 = arith.constant 0 : index
    %c0_7 = arith.constant 0 : index
    %7 = vector.load %arg7[%c0_6, %c0_7] : memref<64x4xf32, #tpu.memory_space<vmem>>, vector<8x4xf32>
    tpu.vector_store %arg7[%c0_6, %c0_7], %6 {strides = array<i32>} : memref<64x4xf32, #tpu.memory_space<vmem>>, vector<8x4xf32>,
    %c0_8 = arith.constant 0 : index
    %c0_9 = arith.constant 0 : index
    %8 = vector.load %arg2[%c0_8, %c0_9] : memref<8x64xbf16, #tpu.memory_space<vmem>>, vector<8x64xbf16>
    %c1 = arith.constant 1 : index
    %c0_10 = arith.constant 0 : index
    %c0_11 = arith.constant 0 : index
    %9 = vector.load %arg1[%c1, %c0_10, %c0_11] : memref<8x64x4xbf16, #tpu.memory_space<vmem>>, vector<1x64x4xbf16>
    %10 = vector.shape_cast %9 : vector<1x64x4xbf16> to vector<64x4xbf16>
    %cst_12 = arith.constant dense<0.000000e+00> : vector<8x4xf32>
    %11 = tpu.matmul %8, %10, %cst_12 {dimension_numbers = #tpu.dot_dimension_numbers<[1], [0], [0], [1], [0, 0, 1, 1], [], []>} : vector<8x64xbf16>, vector<64x4xbf16>, vector<8x4xf32> -> vector<8x4xf32>
    %c0_13 = arith.constant 0 : index
    %c0_14 = arith.constant 0 : index
    %12 = vector.load %arg3[%c0_13, %c0_14] : memref<8x1xf32, #tpu.memory_space<vmem>>, vector<8x1xf32>
    %13 = vector.broadcast %12 : vector<8x1xf32> to vector<8x4xf32>
    %14 = arith.addf %11, %13 : vector<8x4xf32>
    %c8 = arith.constant 8 : index
    %c0_15 = arith.constant 0 : index
    %15 = vector.load %arg7[%c8, %c0_15] : memref<64x4xf32, #tpu.memory_space<vmem>>, vector<8x4xf32>
    tpu.vector_store %arg7[%c8, %c0_15], %14 {strides = array<i32>} : memref<64x4xf32, #tpu.memory_space<vmem>>, vector<8x4xf32>,
    %c0_16 = arith.constant 0 : index
    %c0_17 = arith.constant 0 : index
    %16 = vector.load %arg2[%c0_16, %c0_17] : memref<8x64xbf16, #tpu.memory_space<vmem>>, vector<8x64xbf16>
    %c2 = arith.constant 2 : index
    %c0_18 = arith.constant 0 : index
    %c0_19 = arith.constant 0 : index
    %17 = vector.load %arg1[%c2, %c0_18, %c0_19] : memref<8x64x4xbf16, #tpu.memory_space<vmem>>, vector<1x64x4xbf16>
    %18 = vector.shape_cast %17 : vector<1x64x4xbf16> to vector<64x4xbf16>
    %cst_20 = arith.constant dense<0.000000e+00> : vector<8x4xf32>
    %19 = tpu.matmul %16, %18, %cst_20 {dimension_numbers = #tpu.dot_dimension_numbers<[1], [0], [0], [1], [0, 0, 1, 1], [], []>} : vector<8x64xbf16>, vector<64x4xbf16>, vector<8x4xf32> -> vector<8x4xf32>
    %c0_21 = arith.constant 0 : index
    %c0_22 = arith.constant 0 : index
    %20 = vector.load %arg3[%c0_21, %c0_22] : memref<8x1xf32, #tpu.memory_space<vmem>>, vector<8x1xf32>
    %21 = vector.broadcast %20 : vector<8x1xf32> to vector<8x4xf32>
    %22 = arith.addf %19, %21 : vector<8x4xf32>
    %c16 = arith.constant 16 : index
    %c0_23 = arith.constant 0 : index
    %23 = vector.load %arg7[%c16, %c0_23] : memref<64x4xf32, #tpu.memory_space<vmem>>, vector<8x4xf32>
    tpu.vector_store %arg7[%c16, %c0_23], %22 {strides = array<i32>} : memref<64x4xf32, #tpu.memory_space<vmem>>, vector<8x4xf32>,
    %c0_24 = arith.constant 0 : index
    %c0_25 = arith.constant 0 : index
    %24 = vector.load %arg2[%c0_24, %c0_25] : memref<8x64xbf16, #tpu.memory_space<vmem>>, vector<8x64xbf16>
    %c3 = arith.constant 3 : index
    %c0_26 = arith.constant 0 : index
    %c0_27 = arith.constant 0 : index
    %25 = vector.load %arg1[%c3, %c0_26, %c0_27] : memref<8x64x4xbf16, #tpu.memory_space<vmem>>, vector<1x64x4xbf16>
    %26 = vector.shape_cast %25 : vector<1x64x4xbf16> to vector<64x4xbf16>
    %cst_28 = arith.constant dense<0.000000e+00> : vector<8x4xf32>
    %27 = tpu.matmul %24, %26, %cst_28 {dimension_numbers = #tpu.dot_dimension_numbers<[1], [0], [0], [1], [0, 0, 1, 1], [], []>} : vector<8x64xbf16>, vector<64x4xbf16>, vector<8x4xf32> -> vector<8x4xf32>
    %c0_29 = arith.constant 0 : index
    %c0_30 = arith.constant 0 : index
    %28 = vector.load %arg3[%c0_29, %c0_30] : memref<8x1xf32, #tpu.memory_space<vmem>>, vector<8x1xf32>
    %29 = vector.broadcast %28 : vector<8x1xf32> to vector<8x4xf32>
    %30 = arith.addf %27, %29 : vector<8x4xf32>
    %c24 = arith.constant 24 : index
    %c0_31 = arith.constant 0 : index
    %31 = vector.load %arg7[%c24, %c0_31] : memref<64x4xf32, #tpu.memory_space<vmem>>, vector<8x4xf32>
    tpu.vector_store %arg7[%c24, %c0_31], %30 {strides = array<i32>} : memref<64x4xf32, #tpu.memory_space<vmem>>, vector<8x4xf32>,
    %c0_32 = arith.constant 0 : index
    %c0_33 = arith.constant 0 : index
    %32 = vector.load %arg2[%c0_32, %c0_33] : memref<8x64xbf16, #tpu.memory_space<vmem>>, vector<8x64xbf16>
    %c4 = arith.constant 4 : index
    %c0_34 = arith.constant 0 : index
    %c0_35 = arith.constant 0 : index
    %33 = vector.load %arg1[%c4, %c0_34, %c0_35] : memref<8x64x4xbf16, #tpu.memory_space<vmem>>, vector<1x64x4xbf16>
    %34 = vector.shape_cast %33 : vector<1x64x4xbf16> to vector<64x4xbf16>
    %cst_36 = arith.constant dense<0.000000e+00> : vector<8x4xf32>
    %35 = tpu.matmul %32, %34, %cst_36 {dimension_numbers = #tpu.dot_dimension_numbers<[1], [0], [0], [1], [0, 0, 1, 1], [], []>} : vector<8x64xbf16>, vector<64x4xbf16>, vector<8x4xf32> -> vector<8x4xf32>
    %c0_37 = arith.constant 0 : index
    %c0_38 = arith.constant 0 : index
    %36 = vector.load %arg3[%c0_37, %c0_38] : memref<8x1xf32, #tpu.memory_space<vmem>>, vector<8x1xf32>
    %37 = vector.broadcast %36 : vector<8x1xf32> to vector<8x4xf32>
    %38 = arith.addf %35, %37 : vector<8x4xf32>
    %c32 = arith.constant 32 : index
    %c0_39 = arith.constant 0 : index
    %39 = vector.load %arg7[%c32, %c0_39] : memref<64x4xf32, #tpu.memory_space<vmem>>, vector<8x4xf32>
    tpu.vector_store %arg7[%c32, %c0_39], %38 {strides = array<i32>} : memref<64x4xf32, #tpu.memory_space<vmem>>, vector<8x4xf32>,
    %c0_40 = arith.constant 0 : index
    %c0_41 = arith.constant 0 : index
    %40 = vector.load %arg2[%c0_40, %c0_41] : memref<8x64xbf16, #tpu.memory_space<vmem>>, vector<8x64xbf16>
    %c5 = arith.constant 5 : index
    %c0_42 = arith.constant 0 : index
    %c0_43 = arith.constant 0 : index
    %41 = vector.load %arg1[%c5, %c0_42, %c0_43] : memref<8x64x4xbf16, #tpu.memory_space<vmem>>, vector<1x64x4xbf16>
    %42 = vector.shape_cast %41 : vector<1x64x4xbf16> to vector<64x4xbf16>
    %cst_44 = arith.constant dense<0.000000e+00> : vector<8x4xf32>
    %43 = tpu.matmul %40, %42, %cst_44 {dimension_numbers = #tpu.dot_dimension_numbers<[1], [0], [0], [1], [0, 0, 1, 1], [], []>} : vector<8x64xbf16>, vector<64x4xbf16>, vector<8x4xf32> -> vector<8x4xf32>
    %c0_45 = arith.constant 0 : index
    %c0_46 = arith.constant 0 : index
    %44 = vector.load %arg3[%c0_45, %c0_46] : memref<8x1xf32, #tpu.memory_space<vmem>>, vector<8x1xf32>
    %45 = vector.broadcast %44 : vector<8x1xf32> to vector<8x4xf32>
    %46 = arith.addf %43, %45 : vector<8x4xf32>
    %c40 = arith.constant 40 : index
    %c0_47 = arith.constant 0 : index
    %47 = vector.load %arg7[%c40, %c0_47] : memref<64x4xf32, #tpu.memory_space<vmem>>, vector<8x4xf32>
    tpu.vector_store %arg7[%c40, %c0_47], %46 {strides = array<i32>} : memref<64x4xf32, #tpu.memory_space<vmem>>, vector<8x4xf32>,
    %c0_48 = arith.constant 0 : index
    %c0_49 = arith.constant 0 : index
    %48 = vector.load %arg2[%c0_48, %c0_49] : memref<8x64xbf16, #tpu.memory_space<vmem>>, vector<8x64xbf16>
    %c6 = arith.constant 6 : index
    %c0_50 = arith.constant 0 : index
    %c0_51 = arith.constant 0 : index
    %49 = vector.load %arg1[%c6, %c0_50, %c0_51] : memref<8x64x4xbf16, #tpu.memory_space<vmem>>, vector<1x64x4xbf16>
    %50 = vector.shape_cast %49 : vector<1x64x4xbf16> to vector<64x4xbf16>
    %cst_52 = arith.constant dense<0.000000e+00> : vector<8x4xf32>
    %51 = tpu.matmul %48, %50, %cst_52 {dimension_numbers = #tpu.dot_dimension_numbers<[1], [0], [0], [1], [0, 0, 1, 1], [], []>} : vector<8x64xbf16>, vector<64x4xbf16>, vector<8x4xf32> -> vector<8x4xf32>
    %c0_53 = arith.constant 0 : index
    %c0_54 = arith.constant 0 : index
    %52 = vector.load %arg3[%c0_53, %c0_54] : memref<8x1xf32, #tpu.memory_space<vmem>>, vector<8x1xf32>
    %53 = vector.broadcast %52 : vector<8x1xf32> to vector<8x4xf32>
    %54 = arith.addf %51, %53 : vector<8x4xf32>
    %c48 = arith.constant 48 : index
    %c0_55 = arith.constant 0 : index
    %55 = vector.load %arg7[%c48, %c0_55] : memref<64x4xf32, #tpu.memory_space<vmem>>, vector<8x4xf32>
    tpu.vector_store %arg7[%c48, %c0_55], %54 {strides = array<i32>} : memref<64x4xf32, #tpu.memory_space<vmem>>, vector<8x4xf32>,
    %c0_56 = arith.constant 0 : index
    %c0_57 = arith.constant 0 : index
    %56 = vector.load %arg2[%c0_56, %c0_57] : memref<8x64xbf16, #tpu.memory_space<vmem>>, vector<8x64xbf16>
    %c7 = arith.constant 7 : index
    %c0_58 = arith.constant 0 : index
    %c0_59 = arith.constant 0 : index
    %57 = vector.load %arg1[%c7, %c0_58, %c0_59] : memref<8x64x4xbf16, #tpu.memory_space<vmem>>, vector<1x64x4xbf16>
    %58 = vector.shape_cast %57 : vector<1x64x4xbf16> to vector<64x4xbf16>
    %cst_60 = arith.constant dense<0.000000e+00> : vector<8x4xf32>
    %59 = tpu.matmul %56, %58, %cst_60 {dimension_numbers = #tpu.dot_dimension_numbers<[1], [0], [0], [1], [0, 0, 1, 1], [], []>} : vector<8x64xbf16>, vector<64x4xbf16>, vector<8x4xf32> -> vector<8x4xf32>
    %c0_61 = arith.constant 0 : index
    %c0_62 = arith.constant 0 : index
    %60 = vector.load %arg3[%c0_61, %c0_62] : memref<8x1xf32, #tpu.memory_space<vmem>>, vector<8x1xf32>
    %61 = vector.broadcast %60 : vector<8x1xf32> to vector<8x4xf32>
    %62 = arith.addf %59, %61 : vector<8x4xf32>
    %c56 = arith.constant 56 : index
    %c0_63 = arith.constant 0 : index
    %63 = vector.load %arg7[%c56, %c0_63] : memref<64x4xf32, #tpu.memory_space<vmem>>, vector<8x4xf32>
    tpu.vector_store %arg7[%c56, %c0_63], %62 {strides = array<i32>} : memref<64x4xf32, #tpu.memory_space<vmem>>, vector<8x4xf32>,
    %c0_64 = arith.constant 0 : index
    %c0_65 = arith.constant 0 : index
    %64 = vector.load %arg5[%c0_64, %c0_65] : memref<1x2048xf32, #tpu.memory_space<vmem>>, vector<1x2048xf32>
    %c0_66 = arith.constant 0 : index
    %c0_67 = arith.constant 0 : index
    %65 = tpu.strided_load %arg7[%c0_66, %c0_67] {strides = array<i32: 8, 1>} : memref<64x4xf32, #tpu.memory_space<vmem>>, vector<8x4xf32>
    %66 = arith.truncf %65 : vector<8x4xf32> to vector<8x4xbf16>
    %c0_68 = arith.constant 0 : index
    %c0_69 = arith.constant 0 : index
    %c0_70 = arith.constant 0 : index
    %67 = vector.load %arg4[%c0_68, %c0_69, %c0_70] : memref<8x4x2048xbf16, #tpu.memory_space<vmem>>, vector<1x4x2048xbf16>
    %68 = vector.shape_cast %67 : vector<1x4x2048xbf16> to vector<4x2048xbf16>
    %cst_71 = arith.constant dense<0.000000e+00> : vector<8x2048xf32>
    %69 = tpu.matmul %66, %68, %cst_71 {dimension_numbers = #tpu.dot_dimension_numbers<[1], [0], [0], [1], [0, 0, 1, 1], [], []>} : vector<8x4xbf16>, vector<4x2048xbf16>, vector<8x2048xf32> -> vector<8x2048xf32>
    %70 = vector.broadcast %64 : vector<1x2048xf32> to vector<8x2048xf32>
    %71 = arith.addf %70, %69 : vector<8x2048xf32>
    %c1_72 = arith.constant 1 : index
    %c0_73 = arith.constant 0 : index
    %72 = tpu.strided_load %arg7[%c1_72, %c0_73] {strides = array<i32: 8, 1>} : memref<64x4xf32, #tpu.memory_space<vmem>>, vector<8x4xf32>
    %73 = arith.truncf %72 : vector<8x4xf32> to vector<8x4xbf16>
    %c1_74 = arith.constant 1 : index
    %c0_75 = arith.constant 0 : index
    %c0_76 = arith.constant 0 : index
    %74 = vector.load %arg4[%c1_74, %c0_75, %c0_76] : memref<8x4x2048xbf16, #tpu.memory_space<vmem>>, vector<1x4x2048xbf16>
    %75 = vector.shape_cast %74 : vector<1x4x2048xbf16> to vector<4x2048xbf16>
    %cst_77 = arith.constant dense<0.000000e+00> : vector<8x2048xf32>
    %76 = tpu.matmul %73, %75, %cst_77 {dimension_numbers = #tpu.dot_dimension_numbers<[1], [0], [0], [1], [0, 0, 1, 1], [], []>} : vector<8x4xbf16>, vector<4x2048xbf16>, vector<8x2048xf32> -> vector<8x2048xf32>
    %77 = arith.addf %71, %76 : vector<8x2048xf32>
    %c2_78 = arith.constant 2 : index
    %c0_79 = arith.constant 0 : index
    %78 = tpu.strided_load %arg7[%c2_78, %c0_79] {strides = array<i32: 8, 1>} : memref<64x4xf32, #tpu.memory_space<vmem>>, vector<8x4xf32>
    %79 = arith.truncf %78 : vector<8x4xf32> to vector<8x4xbf16>
    %c2_80 = arith.constant 2 : index
    %c0_81 = arith.constant 0 : index
    %c0_82 = arith.constant 0 : index
    %80 = vector.load %arg4[%c2_80, %c0_81, %c0_82] : memref<8x4x2048xbf16, #tpu.memory_space<vmem>>, vector<1x4x2048xbf16>
    %81 = vector.shape_cast %80 : vector<1x4x2048xbf16> to vector<4x2048xbf16>
    %cst_83 = arith.constant dense<0.000000e+00> : vector<8x2048xf32>
    %82 = tpu.matmul %79, %81, %cst_83 {dimension_numbers = #tpu.dot_dimension_numbers<[1], [0], [0], [1], [0, 0, 1, 1], [], []>} : vector<8x4xbf16>, vector<4x2048xbf16>, vector<8x2048xf32> -> vector<8x2048xf32>
    %83 = arith.addf %77, %82 : vector<8x2048xf32>
    %c3_84 = arith.constant 3 : index
    %c0_85 = arith.constant 0 : index
    %84 = tpu.strided_load %arg7[%c3_84, %c0_85] {strides = array<i32: 8, 1>} : memref<64x4xf32, #tpu.memory_space<vmem>>, vector<8x4xf32>
    %85 = arith.truncf %84 : vector<8x4xf32> to vector<8x4xbf16>
    %c3_86 = arith.constant 3 : index
    %c0_87 = arith.constant 0 : index
    %c0_88 = arith.constant 0 : index
    %86 = vector.load %arg4[%c3_86, %c0_87, %c0_88] : memref<8x4x2048xbf16, #tpu.memory_space<vmem>>, vector<1x4x2048xbf16>
    %87 = vector.shape_cast %86 : vector<1x4x2048xbf16> to vector<4x2048xbf16>
    %cst_89 = arith.constant dense<0.000000e+00> : vector<8x2048xf32>
    %88 = tpu.matmul %85, %87, %cst_89 {dimension_numbers = #tpu.dot_dimension_numbers<[1], [0], [0], [1], [0, 0, 1, 1], [], []>} : vector<8x4xbf16>, vector<4x2048xbf16>, vector<8x2048xf32> -> vector<8x2048xf32>
    %89 = arith.addf %83, %88 : vector<8x2048xf32>
    %c4_90 = arith.constant 4 : index
    %c0_91 = arith.constant 0 : index
    %90 = tpu.strided_load %arg7[%c4_90, %c0_91] {strides = array<i32: 8, 1>} : memref<64x4xf32, #tpu.memory_space<vmem>>, vector<8x4xf32>
    %91 = arith.truncf %90 : vector<8x4xf32> to vector<8x4xbf16>
    %c4_92 = arith.constant 4 : index
    %c0_93 = arith.constant 0 : index
    %c0_94 = arith.constant 0 : index
    %92 = vector.load %arg4[%c4_92, %c0_93, %c0_94] : memref<8x4x2048xbf16, #tpu.memory_space<vmem>>, vector<1x4x2048xbf16>
    %93 = vector.shape_cast %92 : vector<1x4x2048xbf16> to vector<4x2048xbf16>
    %cst_95 = arith.constant dense<0.000000e+00> : vector<8x2048xf32>
    %94 = tpu.matmul %91, %93, %cst_95 {dimension_numbers = #tpu.dot_dimension_numbers<[1], [0], [0], [1], [0, 0, 1, 1], [], []>} : vector<8x4xbf16>, vector<4x2048xbf16>, vector<8x2048xf32> -> vector<8x2048xf32>
    %95 = arith.addf %89, %94 : vector<8x2048xf32>
    %c5_96 = arith.constant 5 : index
    %c0_97 = arith.constant 0 : index
    %96 = tpu.strided_load %arg7[%c5_96, %c0_97] {strides = array<i32: 8, 1>} : memref<64x4xf32, #tpu.memory_space<vmem>>, vector<8x4xf32>
    %97 = arith.truncf %96 : vector<8x4xf32> to vector<8x4xbf16>
    %c5_98 = arith.constant 5 : index
    %c0_99 = arith.constant 0 : index
    %c0_100 = arith.constant 0 : index
    %98 = vector.load %arg4[%c5_98, %c0_99, %c0_100] : memref<8x4x2048xbf16, #tpu.memory_space<vmem>>, vector<1x4x2048xbf16>
    %99 = vector.shape_cast %98 : vector<1x4x2048xbf16> to vector<4x2048xbf16>
    %cst_101 = arith.constant dense<0.000000e+00> : vector<8x2048xf32>
    %100 = tpu.matmul %97, %99, %cst_101 {dimension_numbers = #tpu.dot_dimension_numbers<[1], [0], [0], [1], [0, 0, 1, 1], [], []>} : vector<8x4xbf16>, vector<4x2048xbf16>, vector<8x2048xf32> -> vector<8x2048xf32>
    %101 = arith.addf %95, %100 : vector<8x2048xf32>
    %c6_102 = arith.constant 6 : index
    %c0_103 = arith.constant 0 : index
    %102 = tpu.strided_load %arg7[%c6_102, %c0_103] {strides = array<i32: 8, 1>} : memref<64x4xf32, #tpu.memory_space<vmem>>, vector<8x4xf32>
    %103 = arith.truncf %102 : vector<8x4xf32> to vector<8x4xbf16>
    %c6_104 = arith.constant 6 : index
    %c0_105 = arith.constant 0 : index
    %c0_106 = arith.constant 0 : index
    %104 = vector.load %arg4[%c6_104, %c0_105, %c0_106] : memref<8x4x2048xbf16, #tpu.memory_space<vmem>>, vector<1x4x2048xbf16>
    %105 = vector.shape_cast %104 : vector<1x4x2048xbf16> to vector<4x2048xbf16>
    %cst_107 = arith.constant dense<0.000000e+00> : vector<8x2048xf32>
    %106 = tpu.matmul %103, %105, %cst_107 {dimension_numbers = #tpu.dot_dimension_numbers<[1], [0], [0], [1], [0, 0, 1, 1], [], []>} : vector<8x4xbf16>, vector<4x2048xbf16>, vector<8x2048xf32> -> vector<8x2048xf32>
    %107 = arith.addf %101, %106 : vector<8x2048xf32>
    %c7_108 = arith.constant 7 : index
    %c0_109 = arith.constant 0 : index
    %108 = tpu.strided_load %arg7[%c7_108, %c0_109] {strides = array<i32: 8, 1>} : memref<64x4xf32, #tpu.memory_space<vmem>>, vector<8x4xf32>
    %109 = arith.truncf %108 : vector<8x4xf32> to vector<8x4xbf16>
    %c7_110 = arith.constant 7 : index
    %c0_111 = arith.constant 0 : index
    %c0_112 = arith.constant 0 : index
    %110 = vector.load %arg4[%c7_110, %c0_111, %c0_112] : memref<8x4x2048xbf16, #tpu.memory_space<vmem>>, vector<1x4x2048xbf16>
    %111 = vector.shape_cast %110 : vector<1x4x2048xbf16> to vector<4x2048xbf16>
    %cst_113 = arith.constant dense<0.000000e+00> : vector<8x2048xf32>
    %112 = tpu.matmul %109, %111, %cst_113 {dimension_numbers = #tpu.dot_dimension_numbers<[1], [0], [0], [1], [0, 0, 1, 1], [], []>} : vector<8x4xbf16>, vector<4x2048xbf16>, vector<8x2048xf32> -> vector<8x2048xf32>
    %113 = arith.addf %107, %112 : vector<8x2048xf32>
    %cst_114 = arith.constant 0.000000e+00 : f32
    %114 = vector.broadcast %cst_114 : f32 to vector<8x2048xf32>
    %115 = arith.maximumf %113, %114 : vector<8x2048xf32>
    %116 = arith.truncf %115 : vector<8x2048xf32> to vector<8x2048xbf16>
    %c0_115 = arith.constant 0 : index
    %c0_116 = arith.constant 0 : index
    %117 = vector.load %arg6[%c0_115, %c0_116] : memref<8x2048xbf16, #tpu.memory_space<vmem>>, vector<8x2048xbf16>
    tpu.vector_store %arg6[%c0_115, %c0_116], %116 {strides = array<i32>} : memref<8x2048xbf16, #tpu.memory_space<vmem>>, vector<8x2048xbf16>,
    return
  }
  func.func @transform_0(%arg0: i32) -> (i32, i32, i32) {
    %c0_i32 = arith.constant 0 : i32
    %c0_i32_0 = arith.constant 0 : i32
    %c0_i32_1 = arith.constant 0 : i32
    %c0_i32_2 = arith.constant 0 : i32
    return %c0_i32, %c0_i32_0, %c0_i32_1 : i32, i32, i32
  }
  func.func @transform_1(%arg0: i32) -> (i32, i32) {
    %c0_i32 = arith.constant 0 : i32
    %c0_i32_0 = arith.constant 0 : i32
    %c0_i32_1 = arith.constant 0 : i32
    return %c0_i32, %c0_i32_0 : i32, i32
  }
  func.func @transform_2(%arg0: i32) -> (i32, i32) {
    %c0_i32 = arith.constant 0 : i32
    %c0_i32_0 = arith.constant 0 : i32
    %c0_i32_1 = arith.constant 0 : i32
    return %c0_i32, %c0_i32_0 : i32, i32
  }
  func.func @transform_3(%arg0: i32) -> (i32, i32, i32) {
    %c0_i32 = arith.constant 0 : i32
    %c0_i32_0 = arith.constant 0 : i32
    %c0_i32_1 = arith.constant 0 : i32
    %c0_i32_2 = arith.constant 0 : i32
    return %c0_i32, %c0_i32_0, %c0_i32_1 : i32, i32, i32
  }
  func.func @transform_4(%arg0: i32) -> (i32, i32) {
    %c0_i32 = arith.constant 0 : i32
    %c0_i32_0 = arith.constant 0 : i32
    %c0_i32_1 = arith.constant 0 : i32
    return %c0_i32, %c0_i32_0 : i32, i32
  }
  func.func @transform_5(%arg0: i32) -> (i32, i32) {
    %c0_i32 = arith.constant 0 : i32
    %c0_i32_0 = arith.constant 0 : i32
    %c0_i32_1 = arith.constant 0 : i32
    return %c0_i32, %c0_i32_0 : i32, i32
  }
}

</mosaic_0001>

<bundles_post_ra>
// kernel: tpu_custom_call.1
= control target key start
LH: loop header
LB: loop body
LE: loop exit
PB: predicated region body
PF: predicated region fallthrough
CT: control target
= control target key end

     0   :  { %v3325_v4 = vmov 0   ;;  %vm61_vm0 = vcmask 523264   ;;  %s4309_s0 = inlined_call_operand.vmem [shape: bf16[8,64,4], index: 0, kind: input, shape index: {}]   ;;  %s4310_s1 = inlined_call_operand.vmem [shape: bf16[8,64], index: 1, kind: input, shape index: {}]   ;;  %s4311_s2 = inlined_call_operand.vmem [shape: f32[8,1], index: 2, kind: input, shape index: {}]   ;;  %s4312_s3 = inlined_call_operand.vmem [shape: bf16[8,4,2048], index: 3, kind: input, shape index: {}]   ;;  %s4313_s4 = inlined_call_operand.vmem [shape: f32[1,2048], index: 4, kind: input, shape index: {}]   ;;  %s4314_s5 = inlined_call_operand.hbm [shape: bf16[8,2048], index: 5, kind: output, shape index: {}]  }
   0x1   :  { %v3265_v0 = vld [vmem:[%s4309_s0 + $0x18] sm:$0xff]  ;;  %3297 = vset.pattern.permute.xlu1 %v3325_v4  ;;  %3296 = vset.pattern.permute.xlu0 %v3325_v4  ;;  %v3264_v5 = vld [vmem:[%s4309_s0 + $0x10] sm:$0xff]  ;;  %v3263_v9 = vld [vmem:[%s4309_s0 + $0x8] sm:$0xff] }
   0x2   :  { %v3269_v1 = vld [vmem:[%s4309_s0 + $0x38] sm:$0xff]  ;;  %69 = vmatpush.bf16.msra.mxu0 %v3265_v0  ;;  %v3268_v6 = vld [vmem:[%s4309_s0 + $0x30] sm:$0xff]  ;;  %3298 = vset.pattern.permute.xlu2 %v3325_v4  ;;  %v3267_v10 = vld [vmem:[%s4309_s0 + $0x28] sm:$0xff] }
   0x3   :  { %v3273_v2 = vld [vmem:[%s4309_s0 + $0x58] sm:$0xff]  ;;  %127 = vmatpush.bf16.msra.mxu1 %v3269_v1  ;;  %v3272_v7 = vld [vmem:[%s4309_s0 + $0x50] sm:$0xff]  ;;  %v3271_v11 = vld [vmem:[%s4309_s0 + $0x48] sm:$0xff] }
   0x4   :  { %v3277_v3 = vld [vmem:[%s4309_s0 + $0x78] sm:$0xff]  ;;  %184 = vmatpush.bf16.msra.mxu2 %v3273_v2  ;;  %v3276_v8 = vld [vmem:[%s4309_s0 + $0x70] sm:$0xff]  ;;  %v3275_v12 = vld [vmem:[%s4309_s0 + $0x68] sm:$0xff] }
   0x5   :  { %241 = vmatpush.bf16.msra.mxu3 %v3277_v3  ;;  %v147_v13 = vld [vmem:[%s4311_s2] sm:$0xff]  ;;  %v3289_v18 = vld [vmem:[%s4309_s0 + $0xd8] sm:$0xff] }
   0x6   :  { %70 = vmatpush.bf16.msra.mxu0 %v3264_v5  ;;  %150 = vperm.xlu1 %3297, %v147_v13   ;;  %v3262_v14 = vld [vmem:[%s4309_s0] sm:$0xff]  ;;  %v3293_v19 = vld [vmem:[%s4309_s0 + $0xf8] sm:$0xff] }
   0x7   :  { %128 = vmatpush.bf16.msra.mxu1 %v3268_v6  ;;  %34 = vperm.xlu0 %3296, %v147_v13   ;;  %v3266_v15 = vld [vmem:[%s4309_s0 + $0x20] sm:$0xff] }
   0x8   :  { %185 = vmatpush.bf16.msra.mxu2 %v3272_v7  ;;  %264 = vperm.xlu2 %3298, %v147_v13   ;;  %v3270_v16 = vld [vmem:[%s4309_s0 + $0x40] sm:$0xff] }
   0x9   :  { %242 = vmatpush.bf16.msra.mxu3 %v3276_v8  ;;  %v3274_v17 = vld [vmem:[%s4309_s0 + $0x60] sm:$0xff] }
   0xa   :  { %71 = vmatpush.bf16.msra.mxu0 %v3263_v9 }
   0xb   :  { %129 = vmatpush.bf16.msra.mxu1 %v3267_v10 }
   0xc   :  { %186 = vmatpush.bf16.msra.mxu2 %v3271_v11 }
   0xd   :  { %243 = vmatpush.bf16.msra.mxu3 %v3275_v12 }
   0xe   :  { %10 = vsyncpa [#allocation4], 0  ;;  %72 = vmatpush.bf16.msra.mxu0 %v3262_v14  ;;  %v80_v20 = vld [vmem:[%s4310_s1] sm:$0xf]  ;;  %v3285_v24 = vld [vmem:[%s4309_s0 + $0xb8] sm:$0xff]  ;;  %207 = vperm.xlu1 %3297, %v147_v13   ;;  %vm517_vm1 = vcmask 1041408  }
   0xf   :  { %130 = vmatpush.bf16.msra.mxu1 %v3266_v15  ;;  %v137_v21 = vld [vmem:[%s4310_s1] sm:$0xf]  ;;  %v3281_v25 = vld [vmem:[%s4309_s0 + $0x98] sm:$0xff]  ;;  %v3288_v26 = vld [vmem:[%s4309_s0 + $0xd0] sm:$0xff]  ;;  %93 = vperm.xlu0 %3296, %v147_v13   ;;  %vm78_vm2 = vcmask 31744   ;;  %s2905_s8 = sshll.u32 %s4314_s5, 4  ;;  %s2906_s8 = int_to_ptr.hbm [resolvable:$true] %s2905_s8 }
  0x10   :  { %v22_v22 = vld [vmem:[%s4310_s1] sm:$0xf]  ;;  %187 = vmatpush.bf16.msra.mxu2 %v3270_v16  ;;  %v3292_v27 = vld [vmem:[%s4309_s0 + $0xf0] sm:$0xff]  ;;  %v3287_v30 = vld [vmem:[%s4309_s0 + $0xc8] sm:$0xff]  ;;  %321 = vperm.xlu2 %3298, %v147_v13  }
  0x11   :  { %244 = vmatpush.bf16.msra.mxu3 %v3274_v17  ;;  %v194_v23 = vld [vmem:[%s4310_s1] sm:$0xf]  ;;  %2930 = vmatmul.msk.bf16.vlgmr.msra.gmra.mxu0 %vm61_vm0, %v22_v22  ;;  %v3280_v28 = vld [vmem:[%s4309_s0 + $0x90] sm:$0xff]  ;;  %v3291_v31 = vld [vmem:[%s4309_s0 + $0xe8] sm:$0xff] }
  0x12   :  { %2955 = vmatmul.msk.bf16.vlgmr.msra.gmra.mxu1 %vm61_vm0, %v80_v20  ;;  %298 = vmatpush.bf16.msrb.mxu0 %v3281_v25  ;;  %v3284_v29 = vld [vmem:[%s4309_s0 + $0xb0] sm:$0xff]  ;;  %v3283_v32 = vld [vmem:[%s4309_s0 + $0xa8] sm:$0xff]  ;;  %v3286_v34 = vld [vmem:[%s4309_s0 + $0xc0] sm:$0xff] }
  0x13   :  { %2980 = vmatmul.msk.bf16.vlgmr.msra.gmra.mxu2 %vm61_vm0, %v137_v21  ;;  %355 = vmatpush.bf16.msrb.mxu1 %v3285_v24  ;;  %v3279_v33 = vld [vmem:[%s4309_s0 + $0x88] sm:$0xff]  ;;  %v3290_v35 = vld [vmem:[%s4309_s0 + $0xe0] sm:$0xff]  ;;  %v487_v25 = vld [vmem:[%s4312_s3 + $0x10] sm:$0xff] }
  0x14   :  { %412 = vmatpush.bf16.msrb.mxu2 %v3289_v18  ;;  %3005 = vmatmul.msk.bf16.vlgmr.msra.gmra.mxu3 %vm61_vm0, %v194_v23  ;;  %v3278_v36 = vld [vmem:[%s4309_s0 + $0x80] sm:$0xff]  ;;  %v486_v2 = vld [vmem:[%s4312_s3 + $0x8] sm:$0xff] }
  0x15   :  { %469 = vmatpush.bf16.msrb.mxu3 %v3293_v19  ;;  %v3282_v37 = vld [vmem:[%s4309_s0 + $0xa0] sm:$0xff]  ;;  %493 = vst [vmem:[#allocation1 + $0x20] ss:$4 sm:$0xff] %v486_v2 }
  0x16   :  { %299 = vmatpush.bf16.msrb.mxu0 %v3280_v28  ;;  %435 = vperm.xlu1 %3297, %v147_v13   ;;  %v251_v38 = vld [vmem:[%s4310_s1] sm:$0xf] }
  0x17   :  { %356 = vmatpush.bf16.msrb.mxu1 %v3284_v29  ;;  %378 = vperm.xlu0 %3296, %v147_v13   ;;  %v308_v39 = vld [vmem:[%s4310_s1] sm:$0xf] }
  0x18   :  { %413 = vmatpush.bf16.msrb.mxu2 %v3288_v26  ;;  %v365_v40 = vld [vmem:[%s4310_s1] sm:$0xf] }
  0x19   :  { %470 = vmatpush.bf16.msrb.mxu3 %v3292_v27  ;;  %v422_v41 = vld [vmem:[%s4310_s1] sm:$0xf] }
  0x1a   :  { %300 = vmatpush.bf16.msrb.mxu0 %v3279_v33  ;;  %v485_v43 = vld [vmem:[%s4312_s3] sm:$0xff] }
  0x1b   :  { %357 = vmatpush.bf16.msrb.mxu1 %v3283_v32  ;;  %490 = vst [vmem:[#allocation1] ss:$4 sm:$0xff] %v485_v43 }
  0x1c   :  { %414 = vmatpush.bf16.msrb.mxu2 %v3287_v30  ;;  %v500_v10 = vld.sshfl [vmem:[#allocation1 + $0x30] sm:$0xff pattern:$0x73625140]  ;;  %v501_v14 = vld.sshfl [vmem:[#allocation1 + $0x38] sm:$0xff pattern:$0x73625140] }
  0x1d   :  { %471 = vmatpush.bf16.msrb.mxu3 %v3291_v31  ;;  %v530_v13 = vsel %vm517_vm1, %v500_v10, 0  ;;  %v532_v17 = vsel %vm517_vm1, %v501_v14, 0  ;;  %v498_v18 = vld.sshfl [vmem:[#allocation1 + $0x20] sm:$0xff pattern:$0x73625140] }
  0x1e   :  { %301 = vmatpush.bf16.msrb.mxu0 %v3278_v36  ;;  %v526_v23 = vsel %vm517_vm1, %v498_v18, 0  ;;  %v499_v24 = vld.sshfl [vmem:[#allocation1 + $0x28] sm:$0xff pattern:$0x73625140] }
  0x1f   :  { %358 = vmatpush.bf16.msrb.mxu1 %v3282_v37  ;;  %v528_v26 = vsel %vm517_vm1, %v499_v24, 0 }
  0x20   :  { %415 = vmatpush.bf16.msrb.mxu2 %v3286_v34 }
  0x21   :  { %472 = vmatpush.bf16.msrb.mxu3 %v3290_v35  ;;  %3030 = vmatmul.msk.bf16.vlgmr.msrb.gmra.mxu0 %vm61_vm0, %v251_v38 }
  0x22   :  { %3055 = vmatmul.msk.bf16.vlgmr.msrb.gmra.mxu1 %vm61_vm0, %v308_v39  ;;  %v496_v46 = vld.sshfl [vmem:[#allocation1 + $0x10] sm:$0xff pattern:$0x73625140]  ;;  %v497_v47 = vld.sshfl [vmem:[#allocation1 + $0x18] sm:$0xff pattern:$0x73625140] }
  0x23   :  { %3080 = vmatmul.msk.bf16.vlgmr.msrb.gmra.mxu2 %vm61_vm0, %v365_v40  ;;  %v522_v50 = vsel %vm517_vm1, %v496_v46, 0  ;;  %v524_v51 = vsel %vm517_vm1, %v497_v47, 0  ;;  %v494_v56 = vld.sshfl [vmem:[#allocation1] sm:$0xff pattern:$0x73625140] }
  0x24   :  { %3105 = vmatmul.msk.bf16.vlgmr.msrb.gmra.mxu3 %vm61_vm0, %v422_v41  ;;  %583 = vmatpush.bf16.msra.mxu2 %v522_v50  ;;  %v495_v57 = vld.sshfl [vmem:[#allocation1 + $0x8] sm:$0xff pattern:$0x73625140]  ;;  %v518_v60 = vsel %vm517_vm1, %v494_v56, 0  ;;  %v488_v41 = vld [vmem:[%s4312_s3 + $0x18] sm:$0xff]  ;;  %v3122_v50 = vld [vmem:[%s4312_s3 + $0x20] sm:$0xff] }
  0x25   :  { %596 = vmatpush.bf16.msra.mxu3 %v524_v51  ;;  %v520_v61 = vsel %vm517_vm1, %v495_v57, 0  ;;  %557 = vmatpush.bf16.msra.mxu0 %v518_v60  ;;  %503 = vst [vmem:[#allocation1] ss:$4 sm:$0xff] %v487_v25 }
  0x26   :  { %570 = vmatpush.bf16.msra.mxu1 %v520_v61  ;;  %505 = vst [vmem:[#allocation1 + $0x20] ss:$4 sm:$0xff] %v488_v41 }
  0x28   :  { %635 = vmatpush.bf16.msrb.mxu2 %v530_v13 }
  0x29   :  { %648 = vmatpush.bf16.msrb.mxu3 %v532_v17  ;;  %609 = vmatpush.bf16.msrb.mxu0 %v526_v23  ;;  %v3125_v17 = vld [vmem:[%s4312_s3 + $0x38] sm:$0xff] }
  0x2a   :  { %622 = vmatpush.bf16.msrb.mxu1 %v528_v26  ;;  %v3142_v26 = vld [vmem:[%s4312_s3 + $0x40] sm:$0xff] }
  0x2c   :  { %v508_v32 = vld.sshfl [vmem:[#allocation1 + $0x10] sm:$0xff pattern:$0x73625140]  ;;  %v509_v33 = vld.sshfl [vmem:[#allocation1 + $0x18] sm:$0xff pattern:$0x73625140] }
  0x2d   :  { %v506_v34 = vld.sshfl [vmem:[#allocation1] sm:$0xff pattern:$0x73625140]  ;;  %v538_v36 = vsel %vm517_vm1, %v508_v32, 0  ;;  %v540_v37 = vsel %vm517_vm1, %v509_v33, 0 }
  0x2e   :  { %v507_v38 = vld.sshfl [vmem:[#allocation1 + $0x8] sm:$0xff pattern:$0x73625140]  ;;  %v534_v39 = vsel %vm517_vm1, %v506_v34, 0 }
  0x2f   :  { %v536_v40 = vsel %vm517_vm1, %v507_v38, 0  ;;  %v513_v43 = vld.sshfl [vmem:[#allocation1 + $0x38] sm:$0xff pattern:$0x73625140]  ;;  %819 = vst [vmem:[#allocation1] ss:$4 sm:$0xff] %v3122_v50 }
  0x30   :  { %v548_v47 = vsel %vm517_vm1, %v513_v43, 0 }
  0x36   :  { %v825_v51 = vld.sshfl [vmem:[#allocation1 + $0x10] sm:$0xff pattern:$0x73625140] }
  0x62   :  { %v265_v55 = vpop.permute.xlu2 %264 }
  0x6a   :  { %v322_v7 = vpop.permute.xlu2 %321 }
  0x78   :  { %v151_v44 = vpop.permute.xlu1 %150 }
  0x79   :  { %v35_v42 = vpop.permute.xlu0 %34 }
  0x80   :  { %v208_v54 = vpop.permute.xlu1 %207 }
  0x81   :  { %v94_v45 = vpop.permute.xlu0 %93 }
  0x88   :  { %v436_v11 = vpop.permute.xlu1 %435 }
  0x89   :  { %v379_v12 = vpop.permute.xlu0 %378 }
  0x8e   :  { %v74_v48 = vpop.f32.mrf.mxu0 }
  0x8f   :  { %v132_v49 = vpop.f32.mrf.mxu1  ;;  %v75_v52 = vadd.f32 %v74_v48, %v35_v42  ;;  %v512_v42 = vld.sshfl [vmem:[#allocation1 + $0x30] sm:$0xff pattern:$0x73625140] }
  0x90   :  { %v133_v53 = vadd.f32 %v132_v49, %v94_v45  ;;  %v511_v45 = vld.sshfl [vmem:[#allocation1 + $0x28] sm:$0xff pattern:$0x73625140]  ;;  %v546_v46 = vsel %vm517_vm1, %v512_v42, 0 }
  0x91   :  { %79 = vst.msk [vmem:[#allocation2] sm:$0xff] %vm78_vm2, %v75_v52  ;;  %v544_v49 = vsel %vm517_vm1, %v511_v45, 0  ;;  %v826_v52 = vld.sshfl [vmem:[#allocation1 + $0x18] sm:$0xff pattern:$0x73625140] }
  0x92   :  { %136 = vst.msk [vmem:[#allocation2 + $0x8] sm:$0xff] %vm78_vm2, %v133_v53  ;;  %v823_v53 = vld.sshfl [vmem:[#allocation1] sm:$0xff pattern:$0x73625140]  ;;  %v852_v56 = vsel %vm517_vm1, %v826_v52, 0 }
  0x93   :  { %v846_v57 = vsel %vm517_vm1, %v823_v53, 0 }
  0x96   :  { %v189_v58 = vpop.f32.mrf.mxu2  ;;  %v76_v0 = vpop.f32.mrf.mxu0 }
  0x97   :  { %v246_v59 = vpop.f32.mrf.mxu3  ;;  %v190_v62 = vadd.f32 %v189_v58, %v151_v44  ;;  %v134_v1 = vpop.f32.mrf.mxu1  ;;  %v510_v44 = vld.sshfl [vmem:[#allocation1 + $0x20] sm:$0xff pattern:$0x73625140] }
  0x98   :  { %v247_v63 = vadd.f32 %v246_v59, %v208_v54  ;;  %v542_v48 = vsel %vm517_vm1, %v510_v44, 0  ;;  %v824_v54 = vld.sshfl [vmem:[#allocation1 + $0x8] sm:$0xff pattern:$0x73625140]  ;;  %v3144_v44 = vld [vmem:[%s4312_s3 + $0x50] sm:$0xff] }
  0x99   :  { %193 = vst.msk [vmem:[#allocation2 + $0x10] sm:$0xff] %vm78_vm2, %v190_v62  ;;  %v848_v58 = vsel %vm517_vm1, %v824_v54, 0  ;;  %v3123_v59 = vld [vmem:[%s4312_s3 + $0x28] sm:$0xff] }
  0x9a   :  { %250 = vst.msk [vmem:[#allocation2 + $0x18] sm:$0xff] %vm78_vm2, %v247_v63 }
  0x9b   :  { %822 = vst [vmem:[#allocation1 + $0x20] ss:$4 sm:$0xff] %v3123_v59  ;;  %v3145_v59 = vld [vmem:[%s4312_s3 + $0x58] sm:$0xff] }
  0x9e   :  { %v191_v3 = vpop.f32.mrf.mxu2  ;;  %v303_v5 = vpop.f32.mrf.mxu0 }
  0x9f   :  { %v248_v4 = vpop.f32.mrf.mxu3  ;;  %v360_v6 = vpop.f32.mrf.mxu1  ;;  %v304_v8 = vadd.f32 %v303_v5, %v265_v55  ;;  %v850_v55 = vsel %vm517_vm1, %v825_v51, 0 }
  0xa0   :  { %v361_v9 = vadd.f32 %v360_v6, %v322_v7  ;;  %v3124_v4 = vld [vmem:[%s4312_s3 + $0x30] sm:$0xff] }
  0xa1   :  { %307 = vst.msk [vmem:[#allocation2 + $0x20] sm:$0xff] %vm78_vm2, %v304_v8  ;;  %v481_v29 = vld [vmem:[#allocation2] ss:$8 sm:$0xf] }
  0xa2   :  { %364 = vst.msk [vmem:[#allocation2 + $0x28] sm:$0xff] %vm78_vm2, %v361_v9  ;;  %v829_v60 = vld.sshfl [vmem:[#allocation1 + $0x30] sm:$0xff pattern:$0x73625140] }
  0xa3   :  { %v830_v61 = vld.sshfl [vmem:[#allocation1 + $0x38] sm:$0xff pattern:$0x73625140]  ;;  %v827_v62 = vld.sshfl [vmem:[#allocation1 + $0x20] sm:$0xff pattern:$0x73625140] }
  0xa4   :  { %v828_v63 = vld.sshfl [vmem:[#allocation1 + $0x28] sm:$0xff pattern:$0x73625140]  ;;  %v858_v0 = vsel %vm517_vm1, %v829_v60, 0  ;;  %v860_v1 = vsel %vm517_vm1, %v830_v61, 0  ;;  %v854_v2 = vsel %vm517_vm1, %v827_v62, 0 }
  0xa5   :  { %v856_v3 = vsel %vm517_vm1, %v828_v63, 0  ;;  %832 = vst [vmem:[#allocation1] ss:$4 sm:$0xff] %v3124_v4  ;;  %v809_v6 = vld [vmem:[#allocation2 + $0x1] ss:$8 sm:$0xf] }
  0xa6   :  { %v417_v15 = vpop.f32.mrf.mxu2  ;;  %v305_v21 = vpop.f32.mrf.mxu0  ;;  %834 = vst [vmem:[#allocation1 + $0x20] ss:$4 sm:$0xff] %v3125_v17 }
  0xa7   :  { %v474_v16 = vpop.f32.mrf.mxu3  ;;  %v418_v19 = vadd.f32 %v417_v15, %v379_v12  ;;  %v362_v22 = vpop.f32.mrf.mxu1 }
  0xa8   :  { %v475_v20 = vadd.f32 %v474_v16, %v436_v11 }
  0xa9   :  { %421 = vst.msk [vmem:[#allocation2 + $0x30] sm:$0xff] %vm78_vm2, %v418_v19 }
  0xaa   :  { %478 = vst.msk [vmem:[#allocation2 + $0x38] sm:$0xff] %vm78_vm2, %v475_v20 }
  0xac   :  { %v837_v8 = vld.sshfl [vmem:[#allocation1 + $0x10] sm:$0xff pattern:$0x73625140]  ;;  %v838_v9 = vld.sshfl [vmem:[#allocation1 + $0x18] sm:$0xff pattern:$0x73625140] }
  0xad   :  { %v835_v10 = vld.sshfl [vmem:[#allocation1] sm:$0xff pattern:$0x73625140]  ;;  %v836_v11 = vld.sshfl [vmem:[#allocation1 + $0x8] sm:$0xff pattern:$0x73625140] }
  0xae   :  { %v419_v27 = vpop.f32.mrf.mxu2  ;;  %v866_v13 = vsel %vm517_vm1, %v837_v8, 0  ;;  %v868_v14 = vsel %vm517_vm1, %v838_v9, 0  ;;  %v862_v15 = vsel %vm517_vm1, %v835_v10, 0  ;;  %v864_v16 = vsel %vm517_vm1, %v836_v11, 0  ;;  %1113 = vst [vmem:[#allocation1] ss:$4 sm:$0xff] %v3142_v26 }
  0xaf   :  { %v476_v28 = vpop.f32.mrf.mxu3  ;;  %v841_v18 = vld.sshfl [vmem:[#allocation1 + $0x30] sm:$0xff pattern:$0x73625140]  ;;  %v842_v19 = vld.sshfl [vmem:[#allocation1 + $0x38] sm:$0xff pattern:$0x73625140] }
  0xb0   :  { %v839_v20 = vld.sshfl [vmem:[#allocation1 + $0x20] sm:$0xff pattern:$0x73625140]  ;;  %v840_v21 = vld.sshfl [vmem:[#allocation1 + $0x28] sm:$0xff pattern:$0x73625140] }
  0xb1   :  { %v482_v30 = vld [vmem:[#allocation2] ss:$8 sm:$0xf0]  ;;  %v810_v5 = vld [vmem:[#allocation2 + $0x1] ss:$8 sm:$0xf0] }
  0xb2   :  { %v483_v31 = vor.u32 %v482_v30, %v481_v29  ;;  %v811_v7 = vor.u32 %v810_v5, %v809_v6  ;;  %v874_v22 = vsel %vm517_vm1, %v841_v18, 0  ;;  %v876_v23 = vsel %vm517_vm1, %v842_v19, 0  ;;  %v1104_v45 = vld [vmem:[#allocation2 + $0x2] ss:$8 sm:$0xf0] }
  0xb3   :  { %v870_v24 = vsel %vm517_vm1, %v839_v20, 0  ;;  %v872_v25 = vsel %vm517_vm1, %v840_v21, 0 }
  0xb4   :  { %v3513_v35 = vpack.c.bf16 %v483_v31, %v483_v31  ;;  %v812_v12 = vpack.c.bf16 %v811_v7, %v811_v7 }
  0xb5   :  { %v1119_v27 = vld.sshfl [vmem:[#allocation1 + $0x10] sm:$0xff pattern:$0x73625140]  ;;  %v1120_v28 = vld.sshfl [vmem:[#allocation1 + $0x18] sm:$0xff pattern:$0x73625140] }
  0xb6   :  { %3106 = vmatmul.msk.bf16.vlgmr.msra.gmra.mxu0 %vm78_vm2, %v3513_v35  ;;  %3107 = vmatmul.msk.bf16.vlgmr.msra.gmra.mxu1 %vm78_vm2, %v3513_v35  ;;  %v1117_v29 = vld.sshfl [vmem:[#allocation1] sm:$0xff pattern:$0x73625140]  ;;  %v1118_v30 = vld.sshfl [vmem:[#allocation1 + $0x8] sm:$0xff pattern:$0x73625140] }
  0xb7   :  { %3108 = vmatmul.msk.bf16.vlgmr.msra.gmra.mxu2 %vm78_vm2, %v3513_v35  ;;  %3109 = vmatmul.msk.bf16.vlgmr.msra.gmra.mxu3 %vm78_vm2, %v3513_v35  ;;  %v1144_v31 = vsel %vm517_vm1, %v1119_v27, 0  ;;  %v1146_v32 = vsel %vm517_vm1, %v1120_v28, 0  ;;  %v1140_v33 = vsel %vm517_vm1, %v1117_v29, 0  ;;  %v1142_v34 = vsel %vm517_vm1, %v1118_v30, 0  ;;  %1126 = vst [vmem:[#allocation1] ss:$4 sm:$0xff] %v3144_v44 }
  0xb8   :  { %687 = vmatpush.bf16.msra.mxu2 %v538_v36  ;;  %700 = vmatpush.bf16.msra.mxu3 %v540_v37  ;;  %v3163_v29 = vld [vmem:[%s4312_s3 + $0x68] sm:$0xff] }
  0xb9   :  { %661 = vmatpush.bf16.msra.mxu0 %v534_v39  ;;  %674 = vmatpush.bf16.msra.mxu1 %v536_v40 }
  0xbe   :  { %v1129_v52 = vld.sshfl [vmem:[#allocation1] sm:$0xff pattern:$0x73625140]  ;;  %v1130_v53 = vld.sshfl [vmem:[#allocation1 + $0x8] sm:$0xff pattern:$0x73625140] }
  0xc6   :  { %3110 = vmatmul.msk.bf16.vlgmr.msrb.gmra.mxu0 %vm78_vm2, %v3513_v35  ;;  %3111 = vmatmul.msk.bf16.vlgmr.msrb.gmra.mxu1 %vm78_vm2, %v3513_v35 }
  0xc7   :  { %3112 = vmatmul.msk.bf16.vlgmr.msrb.gmra.mxu2 %vm78_vm2, %v3513_v35  ;;  %3113 = vmatmul.msk.bf16.vlgmr.msrb.gmra.mxu3 %vm78_vm2, %v3513_v35 }
  0xc8   :  { %739 = vmatpush.bf16.msrb.mxu2 %v546_v46  ;;  %752 = vmatpush.bf16.msrb.mxu3 %v548_v47  ;;  %v1103_v46 = vld [vmem:[#allocation2 + $0x2] ss:$8 sm:$0xf] }
  0xc9   :  { %713 = vmatpush.bf16.msrb.mxu0 %v542_v48  ;;  %726 = vmatpush.bf16.msrb.mxu1 %v544_v49  ;;  %v1105_v47 = vor.u32 %v1104_v45, %v1103_v46  ;;  %v1131_v48 = vld.sshfl [vmem:[#allocation1 + $0x10] sm:$0xff pattern:$0x73625140]  ;;  %v1132_v49 = vld.sshfl [vmem:[#allocation1 + $0x18] sm:$0xff pattern:$0x73625140] }
  0xca   :  { %v3164_v46 = vld [vmem:[%s4312_s3 + $0x70] sm:$0xff] }
  0xcb   :  { %v3623_v54 = vpack.c.bf16 %v1105_v47, %v1105_v47 }
  0xd6   :  { %3114 = vmatmul.msk.bf16.vlgmr.msra.gmra.mxu0 %vm78_vm2, %v3513_v35  ;;  %3115 = vmatmul.msk.bf16.vlgmr.msra.gmra.mxu1 %vm78_vm2, %v3513_v35 }
  0xd7   :  { %3116 = vmatmul.msk.bf16.vlgmr.msra.gmra.mxu2 %vm78_vm2, %v3513_v35  ;;  %3117 = vmatmul.msk.bf16.vlgmr.msra.gmra.mxu3 %vm78_vm2, %v3513_v35 }
  0xd8   :  { %911 = vmatpush.bf16.msra.mxu2 %v850_v55  ;;  %924 = vmatpush.bf16.msra.mxu3 %v852_v56  ;;  %v1160_v55 = vsel %vm517_vm1, %v1131_v48, 0  ;;  %v1162_v56 = vsel %vm517_vm1, %v1132_v49, 0  ;;  %v3716_v49 = vld [vmem:[%s4313_s4] sm:$0xff] }
  0xd9   :  { %885 = vmatpush.bf16.msra.mxu0 %v846_v57  ;;  %898 = vmatpush.bf16.msra.mxu1 %v848_v58  ;;  %v1156_v57 = vsel %vm517_vm1, %v1129_v52, 0  ;;  %v1158_v58 = vsel %vm517_vm1, %v1130_v53, 0 }
  0xe6   :  { %3118 = vmatmul.msk.bf16.vlgmr.msrb.gmra.mxu0 %vm78_vm2, %v3513_v35  ;;  %3119 = vmatmul.msk.bf16.vlgmr.msrb.gmra.mxu1 %vm78_vm2, %v3513_v35 }
  0xe7   :  { %3120 = vmatmul.msk.bf16.vlgmr.msrb.gmra.mxu2 %vm78_vm2, %v3513_v35  ;;  %3121 = vmatmul.msk.bf16.vlgmr.msrb.gmra.mxu3 %vm78_vm2, %v3513_v35  ;;  %v3143_v35 = vld [vmem:[%s4312_s3 + $0x48] sm:$0xff] }
  0xe8   :  { %963 = vmatpush.bf16.msrb.mxu2 %v858_v0  ;;  %976 = vmatpush.bf16.msrb.mxu3 %v860_v1  ;;  %1116 = vst [vmem:[#allocation1 + $0x20] ss:$4 sm:$0xff] %v3143_v35 }
  0xe9   :  { %937 = vmatpush.bf16.msrb.mxu0 %v854_v2  ;;  %950 = vmatpush.bf16.msrb.mxu1 %v856_v3 }
  0xef   :  { %v1123_v36 = vld.sshfl [vmem:[#allocation1 + $0x30] sm:$0xff pattern:$0x73625140]  ;;  %v1124_v37 = vld.sshfl [vmem:[#allocation1 + $0x38] sm:$0xff pattern:$0x73625140] }
  0xf0   :  { %v1121_v38 = vld.sshfl [vmem:[#allocation1 + $0x20] sm:$0xff pattern:$0x73625140]  ;;  %v1122_v39 = vld.sshfl [vmem:[#allocation1 + $0x28] sm:$0xff pattern:$0x73625140] }
  0xf1   :  { %v1152_v40 = vsel %vm517_vm1, %v1123_v36, 0  ;;  %v1154_v41 = vsel %vm517_vm1, %v1124_v37, 0  ;;  %v1148_v42 = vsel %vm517_vm1, %v1121_v38, 0  ;;  %v1150_v43 = vsel %vm517_vm1, %v1122_v39, 0  ;;  %1128 = vst [vmem:[#allocation1 + $0x20] ss:$4 sm:$0xff] %v3145_v59 }
  0xf6   :  { %3126 = vmatmul.msk.bf16.vlgmr.msra.gmra.mxu0 %vm78_vm2, %v812_v12  ;;  %3127 = vmatmul.msk.bf16.vlgmr.msra.gmra.mxu1 %vm78_vm2, %v812_v12 }
  0xf7   :  { %3128 = vmatmul.msk.bf16.vlgmr.msra.gmra.mxu2 %vm78_vm2, %v812_v12  ;;  %3129 = vmatmul.msk.bf16.vlgmr.msra.gmra.mxu3 %vm78_vm2, %v812_v12 }
  0xf8   :  { %1015 = vmatpush.bf16.msra.mxu2 %v866_v13  ;;  %1028 = vmatpush.bf16.msra.mxu3 %v868_v14  ;;  %v1135_v2 = vld.sshfl [vmem:[#allocation1 + $0x30] sm:$0xff pattern:$0x73625140]  ;;  %v1136_v3 = vld.sshfl [vmem:[#allocation1 + $0x38] sm:$0xff pattern:$0x73625140] }
  0xf9   :  { %989 = vmatpush.bf16.msra.mxu0 %v862_v15  ;;  %1002 = vmatpush.bf16.msra.mxu1 %v864_v16  ;;  %v1133_v6 = vld.sshfl [vmem:[#allocation1 + $0x20] sm:$0xff pattern:$0x73625140]  ;;  %v1134_v7 = vld.sshfl [vmem:[#allocation1 + $0x28] sm:$0xff pattern:$0x73625140] }
  0xfa   :  { %v1168_v8 = vsel %vm517_vm1, %v1135_v2, 0  ;;  %v1170_v9 = vsel %vm517_vm1, %v1136_v3, 0  ;;  %v1164_v10 = vsel %vm517_vm1, %v1133_v6, 0  ;;  %v1166_v11 = vsel %vm517_vm1, %v1134_v7, 0  ;;  %1410 = vst [vmem:[#allocation1 + $0x20] ss:$4 sm:$0xff] %v3163_v29 }
  0xfb   :  { %v764_v29 = vperm.slane %v3716_v49, 4 }
 0x101   :  { %v1417_v36 = vld.sshfl [vmem:[#allocation1 + $0x30] sm:$0xff pattern:$0x73625140]  ;;  %v1418_v37 = vld.sshfl [vmem:[#allocation1 + $0x38] sm:$0xff pattern:$0x73625140] }
 0x106   :  { %3130 = vmatmul.msk.bf16.vlgmr.msrb.gmra.mxu0 %vm78_vm2, %v812_v12  ;;  %3131 = vmatmul.msk.bf16.vlgmr.msrb.gmra.mxu1 %vm78_vm2, %v812_v12 }
 0x107   :  { %3132 = vmatmul.msk.bf16.vlgmr.msrb.gmra.mxu2 %vm78_vm2, %v812_v12  ;;  %3133 = vmatmul.msk.bf16.vlgmr.msrb.gmra.mxu3 %vm78_vm2, %v812_v12 }
 0x108   :  { %1067 = vmatpush.bf16.msrb.mxu2 %v874_v22  ;;  %1080 = vmatpush.bf16.msrb.mxu3 %v876_v23 }
 0x109   :  { %1041 = vmatpush.bf16.msrb.mxu0 %v870_v24  ;;  %1054 = vmatpush.bf16.msrb.mxu1 %v872_v25 }
 0x116   :  { %3134 = vmatmul.msk.bf16.vlgmr.msra.gmra.mxu0 %vm78_vm2, %v812_v12  ;;  %3135 = vmatmul.msk.bf16.vlgmr.msra.gmra.mxu1 %vm78_vm2, %v812_v12 }
 0x117   :  { %3136 = vmatmul.msk.bf16.vlgmr.msra.gmra.mxu2 %vm78_vm2, %v812_v12  ;;  %3137 = vmatmul.msk.bf16.vlgmr.msra.gmra.mxu3 %vm78_vm2, %v812_v12 }
 0x118   :  { %1205 = vmatpush.bf16.msra.mxu2 %v1144_v31  ;;  %1218 = vmatpush.bf16.msra.mxu3 %v1146_v32 }
 0x119   :  { %1179 = vmatpush.bf16.msra.mxu0 %v1140_v33  ;;  %1192 = vmatpush.bf16.msra.mxu1 %v1142_v34 }
 0x126   :  { %3138 = vmatmul.msk.bf16.vlgmr.msrb.gmra.mxu0 %vm78_vm2, %v812_v12  ;;  %3139 = vmatmul.msk.bf16.vlgmr.msrb.gmra.mxu1 %vm78_vm2, %v812_v12 }
 0x127   :  { %3140 = vmatmul.msk.bf16.vlgmr.msrb.gmra.mxu2 %vm78_vm2, %v812_v12  ;;  %3141 = vmatmul.msk.bf16.vlgmr.msrb.gmra.mxu3 %vm78_vm2, %v812_v12  ;;  %v3162_v12 = vld [vmem:[%s4312_s3 + $0x60] sm:$0xff] }
 0x128   :  { %1257 = vmatpush.bf16.msrb.mxu2 %v1152_v40  ;;  %1270 = vmatpush.bf16.msrb.mxu3 %v1154_v41  ;;  %1407 = vst [vmem:[#allocation1] ss:$4 sm:$0xff] %v3162_v12  ;;  %v1415_v40 = vld.sshfl [vmem:[#allocation1 + $0x20] sm:$0xff pattern:$0x73625140]  ;;  %v762_v12 = vperm.slane %v3716_v49, 2 }
 0x129   :  { %1231 = vmatpush.bf16.msrb.mxu0 %v1148_v42  ;;  %1244 = vmatpush.bf16.msrb.mxu1 %v1150_v43  ;;  %v1416_v41 = vld.sshfl [vmem:[#allocation1 + $0x28] sm:$0xff pattern:$0x73625140]  ;;  %v1446_v42 = vsel %vm517_vm1, %v1417_v36, 0  ;;  %v1448_v43 = vsel %vm517_vm1, %v1418_v37, 0  ;;  %v1442_v44 = vsel %vm517_vm1, %v1415_v40, 0 }
 0x12a   :  { %v1444_v45 = vsel %vm517_vm1, %v1416_v41, 0 }
 0x12f   :  { %v1413_v19 = vld.sshfl [vmem:[#allocation1 + $0x10] sm:$0xff pattern:$0x73625140]  ;;  %v1414_v20 = vld.sshfl [vmem:[#allocation1 + $0x18] sm:$0xff pattern:$0x73625140] }
 0x130   :  { %v1411_v23 = vld.sshfl [vmem:[#allocation1] sm:$0xff pattern:$0x73625140]  ;;  %v1412_v24 = vld.sshfl [vmem:[#allocation1 + $0x8] sm:$0xff pattern:$0x73625140] }
 0x131   :  { %v1438_v25 = vsel %vm517_vm1, %v1413_v19, 0  ;;  %v1440_v26 = vsel %vm517_vm1, %v1414_v20, 0  ;;  %v1434_v27 = vsel %vm517_vm1, %v1411_v23, 0  ;;  %v1436_v28 = vsel %vm517_vm1, %v1412_v24, 0  ;;  %1420 = vst [vmem:[#allocation1] ss:$4 sm:$0xff] %v3164_v46 }
 0x132   :  { %v767_v46 = vperm.slane %v3716_v49, 7 }
 0x133   :  { %v3619_v50 = vpop.f32.mrf.mxu0  ;;  %v3621_v51 = vpop.f32.mrf.mxu1 }
 0x136   :  { %3146 = vmatmul.msk.bf16.vlgmr.msra.gmra.mxu0 %vm78_vm2, %v3623_v54  ;;  %3147 = vmatmul.msk.bf16.vlgmr.msra.gmra.mxu1 %vm78_vm2, %v3623_v54 }
 0x137   :  { %3148 = vmatmul.msk.bf16.vlgmr.msra.gmra.mxu2 %vm78_vm2, %v3623_v54  ;;  %3149 = vmatmul.msk.bf16.vlgmr.msra.gmra.mxu3 %vm78_vm2, %v3623_v54 }
 0x138   :  { %1309 = vmatpush.bf16.msra.mxu2 %v1160_v55  ;;  %1322 = vmatpush.bf16.msra.mxu3 %v1162_v56  ;;  %v760_v55 = vperm.slane %v3716_v49, 0  ;;  %v761_v56 = vperm.slane %v3716_v49, 1  ;;  %v1426_v2 = vld.sshfl [vmem:[#allocation1 + $0x18] sm:$0xff pattern:$0x73625140] }
 0x139   :  { %1283 = vmatpush.bf16.msra.mxu0 %v1156_v57  ;;  %1296 = vmatpush.bf16.msra.mxu1 %v1158_v58  ;;  %v1397_v57 = vld [vmem:[#allocation2 + $0x3] ss:$8 sm:$0xf] }
 0x13a   :  { %v3640_v60 = vpop.f32.mrf.mxu2  ;;  %v3642_v61 = vpop.f32.mrf.mxu3  ;;  %v792_v59 = vadd.f32 %v760_v55, %v3619_v50  ;;  %v1423_v7 = vld.sshfl [vmem:[#allocation1] sm:$0xff pattern:$0x73625140]  ;;  %v763_v50 = vperm.slane %v3716_v49, 3 }
 0x13b   :  { %v561_v62 = vpop.f32.mrf.mxu0  ;;  %v574_v63 = vpop.f32.mrf.mxu1  ;;  %v794_v19 = vadd.f32 %v762_v12, %v3640_v60 }
 0x13c   :  { %v793_v62 = vadd.f32 %v761_v56, %v3621_v51  ;;  %v795_v20 = vadd.f32 %v763_v50, %v3642_v61 }
 0x142   :  { %v587_v0 = vpop.f32.mrf.mxu2  ;;  %v600_v1 = vpop.f32.mrf.mxu3 }
 0x143   :  { %v3644_v4 = vpop.f32.mrf.mxu0  ;;  %v3646_v5 = vpop.f32.mrf.mxu1  ;;  %v1425_v1 = vld.sshfl [vmem:[#allocation1 + $0x10] sm:$0xff pattern:$0x73625140] }
 0x144   :  { %v1454_v51 = vsel %vm517_vm1, %v1425_v1, 0 }
 0x146   :  { %3150 = vmatmul.msk.bf16.vlgmr.msrb.gmra.mxu0 %vm78_vm2, %v3623_v54  ;;  %3151 = vmatmul.msk.bf16.vlgmr.msrb.gmra.mxu1 %vm78_vm2, %v3623_v54 }
 0x147   :  { %3152 = vmatmul.msk.bf16.vlgmr.msrb.gmra.mxu2 %vm78_vm2, %v3623_v54  ;;  %3153 = vmatmul.msk.bf16.vlgmr.msrb.gmra.mxu3 %vm78_vm2, %v3623_v54 }
 0x148   :  { %1361 = vmatpush.bf16.msrb.mxu2 %v1168_v8  ;;  %1374 = vmatpush.bf16.msrb.mxu3 %v1170_v9  ;;  %v1424_v8 = vld.sshfl [vmem:[#allocation1 + $0x8] sm:$0xff pattern:$0x73625140] }
 0x149   :  { %1335 = vmatpush.bf16.msrb.mxu0 %v1164_v10  ;;  %1348 = vmatpush.bf16.msrb.mxu1 %v1166_v11 }
 0x14a   :  { %v3663_v13 = vpop.f32.mrf.mxu2  ;;  %v3665_v14 = vpop.f32.mrf.mxu3 }
 0x14b   :  { %v613_v15 = vpop.f32.mrf.mxu0  ;;  %v626_v16 = vpop.f32.mrf.mxu1  ;;  %v799_v55 = vadd.f32 %v767_v46, %v3665_v14 }
 0x14c   :  { %v1456_v15 = vsel %vm517_vm1, %v1426_v2, 0  ;;  %v1450_v16 = vsel %vm517_vm1, %v1423_v7, 0 }
 0x152   :  { %v639_v17 = vpop.f32.mrf.mxu2  ;;  %v652_v18 = vpop.f32.mrf.mxu3 }
 0x153   :  { %v3667_v21 = vpop.f32.mrf.mxu0  ;;  %v3669_v22 = vpop.f32.mrf.mxu1  ;;  %v1452_v17 = vsel %vm517_vm1, %v1424_v8, 0  ;;  %v3165_v18 = vld [vmem:[%s4312_s3 + $0x78] sm:$0xff] }
 0x154   :  { %1422 = vst [vmem:[#allocation1 + $0x20] ss:$4 sm:$0xff] %v3165_v18 }
 0x156   :  { %3154 = vmatmul.msk.bf16.vlgmr.msra.gmra.mxu0 %vm78_vm2, %v3623_v54  ;;  %3155 = vmatmul.msk.bf16.vlgmr.msra.gmra.mxu1 %vm78_vm2, %v3623_v54 }
 0x157   :  { %3156 = vmatmul.msk.bf16.vlgmr.msra.gmra.mxu2 %vm78_vm2, %v3623_v54  ;;  %3157 = vmatmul.msk.bf16.vlgmr.msra.gmra.mxu3 %vm78_vm2, %v3623_v54 }
 0x158   :  { %1499 = vmatpush.bf16.msra.mxu2 %v1438_v25  ;;  %1512 = vmatpush.bf16.msra.mxu3 %v1440_v26 }
 0x159   :  { %1473 = vmatpush.bf16.msra.mxu0 %v1434_v27  ;;  %1486 = vmatpush.bf16.msra.mxu1 %v1436_v28 }
 0x15a   :  { %v3686_v30 = vpop.f32.mrf.mxu2  ;;  %v3688_v31 = vpop.f32.mrf.mxu3 }
 0x15b   :  { %v665_v32 = vpop.f32.mrf.mxu0  ;;  %v678_v33 = vpop.f32.mrf.mxu1  ;;  %v1430_v36 = vld.sshfl [vmem:[#allocation1 + $0x38] sm:$0xff pattern:$0x73625140]  ;;  %v1427_v41 = vld.sshfl [vmem:[#allocation1 + $0x20] sm:$0xff pattern:$0x73625140] }
 0x15c   :  { %v765_v32 = vperm.slane %v3716_v49, 5  ;;  %v796_v33 = vadd.f32 %v764_v29, %v3644_v4 }
 0x15e   :  { %v797_v60 = vadd.f32 %v765_v32, %v3646_v5  ;;  %v1464_v5 = vsel %vm517_vm1, %v1430_v36, 0 }
 0x162   :  { %v691_v34 = vpop.f32.mrf.mxu2  ;;  %v704_v35 = vpop.f32.mrf.mxu3 }
 0x163   :  { %v3690_v38 = vpop.f32.mrf.mxu0  ;;  %v3692_v39 = vpop.f32.mrf.mxu1  ;;  %v1429_v35 = vld.sshfl [vmem:[#allocation1 + $0x30] sm:$0xff pattern:$0x73625140] }
 0x164   :  { %v1462_v4 = vsel %vm517_vm1, %v1429_v35, 0 }
 0x166   :  { %3158 = vmatmul.msk.bf16.vlgmr.msrb.gmra.mxu0 %vm78_vm2, %v3623_v54  ;;  %3159 = vmatmul.msk.bf16.vlgmr.msrb.gmra.mxu1 %vm78_vm2, %v3623_v54 }
 0x167   :  { %3160 = vmatmul.msk.bf16.vlgmr.msrb.gmra.mxu2 %vm78_vm2, %v3623_v54  ;;  %3161 = vmatmul.msk.bf16.vlgmr.msrb.gmra.mxu3 %vm78_vm2, %v3623_v54  ;;  %v1398_v54 = vld [vmem:[#allocation2 + $0x3] ss:$8 sm:$0xf0] }
 0x168   :  { %1551 = vmatpush.bf16.msrb.mxu2 %v1446_v42  ;;  %1564 = vmatpush.bf16.msrb.mxu3 %v1448_v43  ;;  %v1399_v58 = vor.u32 %v1398_v54, %v1397_v57  ;;  %v1428_v42 = vld.sshfl [vmem:[#allocation1 + $0x28] sm:$0xff pattern:$0x73625140] }
 0x169   :  { %1525 = vmatpush.bf16.msrb.mxu0 %v1442_v44  ;;  %1538 = vmatpush.bf16.msrb.mxu1 %v1444_v45  ;;  %v766_v45 = vperm.slane %v3716_v49, 6  ;;  %v3182_v49 = vld [vmem:[%s4312_s3 + $0x80] sm:$0xff] }
 0x16a   :  { %v3709_v47 = vpop.f32.mrf.mxu2  ;;  %v3711_v48 = vpop.f32.mrf.mxu3  ;;  %v3722_v9 = vpack.c.bf16 %v1399_v58, %v1399_v58  ;;  %1701 = vst [vmem:[#allocation1] ss:$4 sm:$0xff] %v3182_v49  ;;  %v3781_v58 = vld [vmem:[%s4313_s4 + $0x8] sm:$0xff] }
 0x16b   :  { %v717_v52 = vpop.f32.mrf.mxu0  ;;  %v730_v53 = vpop.f32.mrf.mxu1  ;;  %v798_v54 = vadd.f32 %v766_v45, %v3663_v13  ;;  %v768_v1 = vperm.slane %v3781_v58, 0  ;;  %v769_v13 = vperm.slane %v3781_v58, 1  ;;  %v770_v18 = vperm.slane %v3781_v58, 2 }
 0x16c   :  { %v1458_v52 = vsel %vm517_vm1, %v1427_v41, 0  ;;  %v1460_v53 = vsel %vm517_vm1, %v1428_v42, 0  ;;  %v772_v35 = vperm.slane %v3781_v58, 4  ;;  %v773_v36 = vperm.slane %v3781_v58, 5 }
 0x16d   :  { %v800_v14 = vadd.f32 %v768_v1, %v3667_v21  ;;  %v801_v2 = vadd.f32 %v769_v13, %v3669_v22  ;;  %v774_v49 = vperm.slane %v3781_v58, 6 }
 0x171   :  { %v1707_v7 = vld.sshfl [vmem:[#allocation1 + $0x10] sm:$0xff pattern:$0x73625140]  ;;  %v1708_v8 = vld.sshfl [vmem:[#allocation1 + $0x18] sm:$0xff pattern:$0x73625140] }
 0x172   :  { %v743_v63 = vpop.f32.mrf.mxu2  ;;  %v756_v0 = vpop.f32.mrf.mxu3  ;;  %v1732_v21 = vsel %vm517_vm1, %v1707_v7, 0  ;;  %v1734_v22 = vsel %vm517_vm1, %v1708_v8, 0 }
 0x173   :  { %v887_v3 = vpop.f32.mrf.mxu0  ;;  %v900_v6 = vpop.f32.mrf.mxu1 }
 0x174   :  { %v3724_v10 = vadd.f32 %v887_v3, %v792_v59  ;;  %v3726_v11 = vadd.f32 %v900_v6, %v793_v62 }
 0x176   :  { %3166 = vmatmul.msk.bf16.vlgmr.msra.gmra.mxu0 %vm78_vm2, %v3722_v9  ;;  %3167 = vmatmul.msk.bf16.vlgmr.msra.gmra.mxu1 %vm78_vm2, %v3722_v9 }
 0x177   :  { %3168 = vmatmul.msk.bf16.vlgmr.msra.gmra.mxu2 %vm78_vm2, %v3722_v9  ;;  %3169 = vmatmul.msk.bf16.vlgmr.msra.gmra.mxu3 %vm78_vm2, %v3722_v9 }
 0x178   :  { %1603 = vmatpush.bf16.msra.mxu2 %v1454_v51  ;;  %1616 = vmatpush.bf16.msra.mxu3 %v1456_v15  ;;  %v1705_v51 = vld.sshfl [vmem:[#allocation1] sm:$0xff pattern:$0x73625140]  ;;  %v1706_v15 = vld.sshfl [vmem:[#allocation1 + $0x8] sm:$0xff pattern:$0x73625140] }
 0x179   :  { %1577 = vmatpush.bf16.msra.mxu0 %v1450_v16  ;;  %1590 = vmatpush.bf16.msra.mxu1 %v1452_v17 }
 0x17a   :  { %v913_v23 = vpop.f32.mrf.mxu2  ;;  %v926_v24 = vpop.f32.mrf.mxu3 }
 0x17b   :  { %v3747_v25 = vadd.f32 %v913_v23, %v794_v19  ;;  %v3749_v26 = vadd.f32 %v926_v24, %v795_v20  ;;  %v889_v27 = vpop.f32.mrf.mxu0  ;;  %v902_v28 = vpop.f32.mrf.mxu1  ;;  %v771_v19 = vperm.slane %v3781_v58, 3  ;;  %v1728_v20 = vsel %vm517_vm1, %v1705_v51, 0  ;;  %v3183_v24 = vld [vmem:[%s4312_s3 + $0x88] sm:$0xff] }
 0x17c   :  { %v1730_v23 = vsel %vm517_vm1, %v1706_v15, 0  ;;  %1704 = vst [vmem:[#allocation1 + $0x20] ss:$4 sm:$0xff] %v3183_v24  ;;  %v802_v27 = vadd.f32 %v770_v18, %v3686_v30  ;;  %v805_v30 = vadd.f32 %v773_v36, %v3692_v39 }
 0x17d   :  { %v803_v28 = vadd.f32 %v771_v19, %v3688_v31 }
 0x182   :  { %v915_v34 = vpop.f32.mrf.mxu2  ;;  %v928_v61 = vpop.f32.mrf.mxu3 }
 0x183   :  { %v939_v37 = vpop.f32.mrf.mxu0  ;;  %v952_v40 = vpop.f32.mrf.mxu1  ;;  %v1711_v41 = vld.sshfl [vmem:[#allocation1 + $0x30] sm:$0xff pattern:$0x73625140]  ;;  %v1712_v42 = vld.sshfl [vmem:[#allocation1 + $0x38] sm:$0xff pattern:$0x73625140] }
 0x184   :  { %v3755_v43 = vadd.f32 %v939_v37, %v796_v33  ;;  %v3757_v44 = vadd.f32 %v952_v40, %v797_v60  ;;  %v804_v37 = vadd.f32 %v772_v35, %v3690_v38  ;;  %v1740_v38 = vsel %vm517_vm1, %v1711_v41, 0 }
 0x185   :  { %v1742_v39 = vsel %vm517_vm1, %v1712_v42, 0 }
 0x186   :  { %3170 = vmatmul.msk.bf16.vlgmr.msrb.gmra.mxu0 %vm78_vm2, %v3722_v9  ;;  %3171 = vmatmul.msk.bf16.vlgmr.msrb.gmra.mxu1 %vm78_vm2, %v3722_v9 }
 0x187   :  { %3172 = vmatmul.msk.bf16.vlgmr.msrb.gmra.mxu2 %vm78_vm2, %v3722_v9  ;;  %3173 = vmatmul.msk.bf16.vlgmr.msrb.gmra.mxu3 %vm78_vm2, %v3722_v9 }
 0x188   :  { %1655 = vmatpush.bf16.msrb.mxu2 %v1462_v4  ;;  %1668 = vmatpush.bf16.msrb.mxu3 %v1464_v5  ;;  %v1709_v4 = vld.sshfl [vmem:[#allocation1 + $0x20] sm:$0xff pattern:$0x73625140]  ;;  %v1710_v5 = vld.sshfl [vmem:[#allocation1 + $0x28] sm:$0xff pattern:$0x73625140] }
 0x189   :  { %1629 = vmatpush.bf16.msrb.mxu0 %v1458_v52  ;;  %1642 = vmatpush.bf16.msrb.mxu1 %v1460_v53 }
 0x18a   :  { %v965_v56 = vpop.f32.mrf.mxu2  ;;  %v978_v57 = vpop.f32.mrf.mxu3 }
 0x18b   :  { %v3783_v59 = vadd.f32 %v965_v56, %v798_v54  ;;  %v3785_v62 = vadd.f32 %v978_v57, %v799_v55  ;;  %v941_v63 = vpop.f32.mrf.mxu0  ;;  %v954_v0 = vpop.f32.mrf.mxu1  ;;  %v775_v54 = vperm.slane %v3781_v58, 7  ;;  %v1736_v55 = vsel %vm517_vm1, %v1709_v4, 0  ;;  %v3184_v57 = vld [vmem:[%s4312_s3 + $0x90] sm:$0xff] }
 0x18c   :  { %v1738_v56 = vsel %vm517_vm1, %v1710_v5, 0  ;;  %1714 = vst [vmem:[#allocation1] ss:$4 sm:$0xff] %v3184_v57  ;;  %v806_v58 = vadd.f32 %v774_v49, %v3709_v47 }
 0x18d   :  { %v807_v63 = vadd.f32 %v775_v54, %v3711_v48 }
 0x192   :  { %v967_v3 = vpop.f32.mrf.mxu2  ;;  %v980_v6 = vpop.f32.mrf.mxu3 }
 0x193   :  { %v991_v12 = vpop.f32.mrf.mxu0  ;;  %v1004_v50 = vpop.f32.mrf.mxu1  ;;  %v1692_v3 = vld [vmem:[#allocation2 + $0x4] ss:$8 sm:$0xf0] }
 0x194   :  { %v3791_v16 = vadd.f32 %v991_v12, %v800_v14  ;;  %v3793_v17 = vadd.f32 %v1004_v50, %v801_v2  ;;  %v1691_v6 = vld [vmem:[#allocation2 + $0x4] ss:$8 sm:$0xf] }
 0x195   :  { %v1693_v7 = vor.u32 %v1692_v3, %v1691_v6  ;;  %v1719_v50 = vld.sshfl [vmem:[#allocation1 + $0x10] sm:$0xff pattern:$0x73625140]  ;;  %v1720_v51 = vld.sshfl [vmem:[#allocation1 + $0x18] sm:$0xff pattern:$0x73625140] }
 0x196   :  { %3174 = vmatmul.msk.bf16.vlgmr.msra.gmra.mxu0 %vm78_vm2, %v3722_v9  ;;  %3175 = vmatmul.msk.bf16.vlgmr.msra.gmra.mxu1 %vm78_vm2, %v3722_v9  ;;  %v1717_v48 = vld.sshfl [vmem:[#allocation1] sm:$0xff pattern:$0x73625140]  ;;  %v1718_v18 = vld.sshfl [vmem:[#allocation1 + $0x8] sm:$0xff pattern:$0x73625140] }
 0x197   :  { %3176 = vmatmul.msk.bf16.vlgmr.msra.gmra.mxu2 %vm78_vm2, %v3722_v9  ;;  %3177 = vmatmul.msk.bf16.vlgmr.msra.gmra.mxu3 %vm78_vm2, %v3722_v9  ;;  %v3849_v19 = vpack.c.bf16 %v1693_v7, %v1693_v7  ;;  %v1744_v24 = vsel %vm517_vm1, %v1717_v48, 0 }
 0x198   :  { %1793 = vmatpush.bf16.msra.mxu2 %v1732_v21  ;;  %1806 = vmatpush.bf16.msra.mxu3 %v1734_v22 }
 0x199   :  { %1767 = vmatpush.bf16.msra.mxu0 %v1728_v20  ;;  %1780 = vmatpush.bf16.msra.mxu1 %v1730_v23  ;;  %v1748_v20 = vsel %vm517_vm1, %v1719_v50, 0  ;;  %v1750_v23 = vsel %vm517_vm1, %v1720_v51, 0 }
 0x19a   :  { %v1017_v29 = vpop.f32.mrf.mxu2  ;;  %v1030_v32 = vpop.f32.mrf.mxu3 }
 0x19b   :  { %v3814_v33 = vadd.f32 %v1017_v29, %v802_v27  ;;  %v3816_v60 = vadd.f32 %v1030_v32, %v803_v28  ;;  %v993_v34 = vpop.f32.mrf.mxu0  ;;  %v1006_v61 = vpop.f32.mrf.mxu1  ;;  %v1746_v27 = vsel %vm517_vm1, %v1718_v18, 0 }
 0x1a2   :  { %v1019_v40 = vpop.f32.mrf.mxu2  ;;  %v1032_v31 = vpop.f32.mrf.mxu3 }
 0x1a3   :  { %v1043_v45 = vpop.f32.mrf.mxu0  ;;  %v1056_v46 = vpop.f32.mrf.mxu1 }
 0x1a4   :  { %v3822_v52 = vadd.f32 %v1043_v45, %v804_v37  ;;  %v3824_v53 = vadd.f32 %v1056_v46, %v805_v30 }
 0x1a6   :  { %3178 = vmatmul.msk.bf16.vlgmr.msrb.gmra.mxu0 %vm78_vm2, %v3722_v9  ;;  %3179 = vmatmul.msk.bf16.vlgmr.msrb.gmra.mxu1 %vm78_vm2, %v3722_v9 }
 0x1a7   :  { %3180 = vmatmul.msk.bf16.vlgmr.msrb.gmra.mxu2 %vm78_vm2, %v3722_v9  ;;  %3181 = vmatmul.msk.bf16.vlgmr.msrb.gmra.mxu3 %vm78_vm2, %v3722_v9 }
 0x1a8   :  { %1845 = vmatpush.bf16.msrb.mxu2 %v1740_v38  ;;  %1858 = vmatpush.bf16.msrb.mxu3 %v1742_v39 }
 0x1a9   :  { %1819 = vmatpush.bf16.msrb.mxu0 %v1736_v55  ;;  %1832 = vmatpush.bf16.msrb.mxu1 %v1738_v56 }
 0x1aa   :  { %v1069_v0 = vpop.f32.mrf.mxu2  ;;  %v1082_v1 = vpop.f32.mrf.mxu3 }
 0x1ab   :  { %v3845_v13 = vadd.f32 %v1069_v0, %v806_v58  ;;  %v3847_v14 = vadd.f32 %v1082_v1, %v807_v63  ;;  %v1045_v9 = vpop.f32.mrf.mxu0  ;;  %v1058_v2 = vpop.f32.mrf.mxu1 }
 0x1b2   :  { %v1071_v8 = vpop.f32.mrf.mxu2  ;;  %v1084_v12 = vpop.f32.mrf.mxu3 }
 0x1b3   :  { %v1181_v47 = vpop.f32.mrf.mxu0  ;;  %v1194_v15 = vpop.f32.mrf.mxu1 }
 0x1b4   :  { %v3852_v21 = vadd.f32 %v1181_v47, %v3724_v10  ;;  %v3855_v22 = vadd.f32 %v1194_v15, %v3726_v11  ;;  %v3185_v10 = vld [vmem:[%s4312_s3 + $0x98] sm:$0xff] }
 0x1b5   :  { %1716 = vst [vmem:[#allocation1 + $0x20] ss:$4 sm:$0xff] %v3185_v10 }
 0x1b6   :  { %3186 = vmatmul.msk.bf16.vlgmr.msra.gmra.mxu0 %vm78_vm2, %v3849_v19  ;;  %3187 = vmatmul.msk.bf16.vlgmr.msra.gmra.mxu1 %vm78_vm2, %v3849_v19 }
 0x1b7   :  { %3188 = vmatmul.msk.bf16.vlgmr.msra.gmra.mxu2 %vm78_vm2, %v3849_v19  ;;  %3189 = vmatmul.msk.bf16.vlgmr.msra.gmra.mxu3 %vm78_vm2, %v3849_v19 }
 0x1b8   :  { %1897 = vmatpush.bf16.msra.mxu2 %v1748_v20  ;;  %1910 = vmatpush.bf16.msra.mxu3 %v1750_v23 }
 0x1b9   :  { %1871 = vmatpush.bf16.msra.mxu0 %v1744_v24  ;;  %1884 = vmatpush.bf16.msra.mxu1 %v1746_v27 }
 0x1ba   :  { %v1207_v11 = vpop.f32.mrf.mxu2  ;;  %v1220_v28 = vpop.f32.mrf.mxu3 }
 0x1bb   :  { %v3873_v29 = vadd.f32 %v1207_v11, %v3747_v25  ;;  %v3876_v32 = vadd.f32 %v1220_v28, %v3749_v26  ;;  %v1183_v34 = vpop.f32.mrf.mxu0  ;;  %v1196_v61 = vpop.f32.mrf.mxu1 }
 0x1bc   :  { %v1723_v37 = vld.sshfl [vmem:[#allocation1 + $0x30] sm:$0xff pattern:$0x73625140]  ;;  %v1724_v30 = vld.sshfl [vmem:[#allocation1 + $0x38] sm:$0xff pattern:$0x73625140] }
 0x1bd   :  { %v1721_v41 = vld.sshfl [vmem:[#allocation1 + $0x20] sm:$0xff pattern:$0x73625140]  ;;  %v1722_v42 = vld.sshfl [vmem:[#allocation1 + $0x28] sm:$0xff pattern:$0x73625140] }
 0x1be   :  { %v1756_v25 = vsel %vm517_vm1, %v1723_v37, 0  ;;  %v1758_v26 = vsel %vm517_vm1, %v1724_v30, 0  ;;  %v1752_v4 = vsel %vm517_vm1, %v1721_v41, 0  ;;  %v1754_v5 = vsel %vm517_vm1, %v1722_v42, 0 }
 0x1bf   :  { %v1985_v41 = vld [vmem:[#allocation2 + $0x5] ss:$8 sm:$0xf] }
 0x1c2   :  { %v1209_v35 = vpop.f32.mrf.mxu2  ;;  %v1222_v36 = vpop.f32.mrf.mxu3 }
 0x1c3   :  { %v1233_v40 = vpop.f32.mrf.mxu0  ;;  %v1246_v31 = vpop.f32.mrf.mxu1 }
 0x1c4   :  { %v3879_v45 = vadd.f32 %v1233_v40, %v3755_v43  ;;  %v3882_v46 = vadd.f32 %v1246_v31, %v3757_v44  ;;  %v3202_v43 = vld [vmem:[%s4312_s3 + $0xa0] sm:$0xff] }
 0x1c5   :  { %1995 = vst [vmem:[#allocation1] ss:$4 sm:$0xff] %v3202_v43 }
 0x1c6   :  { %3190 = vmatmul.msk.bf16.vlgmr.msrb.gmra.mxu0 %vm78_vm2, %v3849_v19  ;;  %3191 = vmatmul.msk.bf16.vlgmr.msrb.gmra.mxu1 %vm78_vm2, %v3849_v19 }
 0x1c7   :  { %3192 = vmatmul.msk.bf16.vlgmr.msrb.gmra.mxu2 %vm78_vm2, %v3849_v19  ;;  %3193 = vmatmul.msk.bf16.vlgmr.msrb.gmra.mxu3 %vm78_vm2, %v3849_v19 }
 0x1c8   :  { %1949 = vmatpush.bf16.msrb.mxu2 %v1756_v25  ;;  %1962 = vmatpush.bf16.msrb.mxu3 %v1758_v26 }
 0x1c9   :  { %1923 = vmatpush.bf16.msrb.mxu0 %v1752_v4  ;;  %1936 = vmatpush.bf16.msrb.mxu1 %v1754_v5 }
 0x1ca   :  { %v1259_v44 = vpop.f32.mrf.mxu2  ;;  %v1272_v49 = vpop.f32.mrf.mxu3 }
 0x1cb   :  { %v3900_v54 = vadd.f32 %v1259_v44, %v3783_v59  ;;  %v3903_v38 = vadd.f32 %v1272_v49, %v3785_v62  ;;  %v1235_v39 = vpop.f32.mrf.mxu0  ;;  %v1248_v55 = vpop.f32.mrf.mxu1 }
 0x1cc   :  { %v2001_v58 = vld.sshfl [vmem:[#allocation1 + $0x10] sm:$0xff pattern:$0x73625140]  ;;  %v2002_v63 = vld.sshfl [vmem:[#allocation1 + $0x18] sm:$0xff pattern:$0x73625140] }
 0x1cd   :  { %v1999_v9 = vld.sshfl [vmem:[#allocation1] sm:$0xff pattern:$0x73625140]  ;;  %v2000_v2 = vld.sshfl [vmem:[#allocation1 + $0x8] sm:$0xff pattern:$0x73625140] }
 0x1ce   :  { %v2026_v59 = vsel %vm517_vm1, %v2001_v58, 0  ;;  %v2028_v62 = vsel %vm517_vm1, %v2002_v63, 0  ;;  %v2022_v7 = vsel %vm517_vm1, %v1999_v9, 0  ;;  %v2024_v8 = vsel %vm517_vm1, %v2000_v2, 0 }
 0x1d2   :  { %v1261_v56 = vpop.f32.mrf.mxu2  ;;  %v1274_v57 = vpop.f32.mrf.mxu3 }
 0x1d3   :  { %v1285_v0 = vpop.f32.mrf.mxu0  ;;  %v1298_v1 = vpop.f32.mrf.mxu1 }
 0x1d4   :  { %v3906_v3 = vadd.f32 %v1285_v0, %v3791_v16  ;;  %v3909_v6 = vadd.f32 %v1298_v1, %v3793_v17  ;;  %v3203_v16 = vld [vmem:[%s4312_s3 + $0xa8] sm:$0xff] }
 0x1d5   :  { %1998 = vst [vmem:[#allocation1 + $0x20] ss:$4 sm:$0xff] %v3203_v16 }
 0x1d6   :  { %3194 = vmatmul.msk.bf16.vlgmr.msra.gmra.mxu0 %vm78_vm2, %v3849_v19  ;;  %3195 = vmatmul.msk.bf16.vlgmr.msra.gmra.mxu1 %vm78_vm2, %v3849_v19 }
 0x1d7   :  { %3196 = vmatmul.msk.bf16.vlgmr.msra.gmra.mxu2 %vm78_vm2, %v3849_v19  ;;  %3197 = vmatmul.msk.bf16.vlgmr.msra.gmra.mxu3 %vm78_vm2, %v3849_v19 }
 0x1d8   :  { %2087 = vmatpush.bf16.msra.mxu2 %v2026_v59  ;;  %2100 = vmatpush.bf16.msra.mxu3 %v2028_v62 }
 0x1d9   :  { %2061 = vmatpush.bf16.msra.mxu0 %v2022_v7  ;;  %2074 = vmatpush.bf16.msra.mxu1 %v2024_v8 }
 0x1da   :  { %v1311_v17 = vpop.f32.mrf.mxu2  ;;  %v1324_v12 = vpop.f32.mrf.mxu3 }
 0x1db   :  { %v3927_v50 = vadd.f32 %v1311_v17, %v3814_v33  ;;  %v3930_v51 = vadd.f32 %v1324_v12, %v3816_v60  ;;  %v1287_v47 = vpop.f32.mrf.mxu0  ;;  %v1300_v15 = vpop.f32.mrf.mxu1 }
 0x1dc   :  { %v2005_v20 = vld.sshfl [vmem:[#allocation1 + $0x30] sm:$0xff pattern:$0x73625140]  ;;  %v2006_v23 = vld.sshfl [vmem:[#allocation1 + $0x38] sm:$0xff pattern:$0x73625140] }
 0x1dd   :  { %v2003_v10 = vld.sshfl [vmem:[#allocation1 + $0x20] sm:$0xff pattern:$0x73625140]  ;;  %v2004_v11 = vld.sshfl [vmem:[#allocation1 + $0x28] sm:$0xff pattern:$0x73625140] }
 0x1de   :  { %v2034_v33 = vsel %vm517_vm1, %v2005_v20, 0  ;;  %v2036_v60 = vsel %vm517_vm1, %v2006_v23, 0  ;;  %v2030_v61 = vsel %vm517_vm1, %v2003_v10, 0  ;;  %v2032_v35 = vsel %vm517_vm1, %v2004_v11, 0 }
 0x1e2   :  { %v1313_v48 = vpop.f32.mrf.mxu2  ;;  %v1326_v18 = vpop.f32.mrf.mxu3 }
 0x1e3   :  { %v1337_v24 = vpop.f32.mrf.mxu0  ;;  %v1350_v27 = vpop.f32.mrf.mxu1 }
 0x1e4   :  { %v3933_v28 = vadd.f32 %v1337_v24, %v3822_v52  ;;  %v3936_v34 = vadd.f32 %v1350_v27, %v3824_v53  ;;  %v3204_v52 = vld [vmem:[%s4312_s3 + $0xb0] sm:$0xff] }
 0x1e5   :  { %2008 = vst [vmem:[#allocation1] ss:$4 sm:$0xff] %v3204_v52 }
 0x1e6   :  { %3198 = vmatmul.msk.bf16.vlgmr.msrb.gmra.mxu0 %vm78_vm2, %v3849_v19  ;;  %3199 = vmatmul.msk.bf16.vlgmr.msrb.gmra.mxu1 %vm78_vm2, %v3849_v19 }
 0x1e7   :  { %3200 = vmatmul.msk.bf16.vlgmr.msrb.gmra.mxu2 %vm78_vm2, %v3849_v19  ;;  %3201 = vmatmul.msk.bf16.vlgmr.msrb.gmra.mxu3 %vm78_vm2, %v3849_v19  ;;  %v1986_v19 = vld [vmem:[#allocation2 + $0x5] ss:$8 sm:$0xf0] }
 0x1e8   :  { %2139 = vmatpush.bf16.msrb.mxu2 %v2034_v33  ;;  %2152 = vmatpush.bf16.msrb.mxu3 %v2036_v60  ;;  %v1987_v42 = vor.u32 %v1986_v19, %v1985_v41 }
 0x1e9   :  { %2113 = vmatpush.bf16.msrb.mxu0 %v2030_v61  ;;  %2126 = vmatpush.bf16.msrb.mxu1 %v2032_v35 }
 0x1ea   :  { %v1363_v53 = vpop.f32.mrf.mxu2  ;;  %v1376_v36 = vpop.f32.mrf.mxu3  ;;  %v3959_v55 = vpack.c.bf16 %v1987_v42, %v1987_v42 }
 0x1eb   :  { %v3954_v37 = vadd.f32 %v1363_v53, %v3845_v13  ;;  %v3957_v30 = vadd.f32 %v1376_v36, %v3847_v14  ;;  %v1339_v40 = vpop.f32.mrf.mxu0  ;;  %v1352_v31 = vpop.f32.mrf.mxu1 }
 0x1ec   :  { %v2013_v4 = vld.sshfl [vmem:[#allocation1 + $0x10] sm:$0xff pattern:$0x73625140]  ;;  %v2014_v5 = vld.sshfl [vmem:[#allocation1 + $0x18] sm:$0xff pattern:$0x73625140] }
 0x1ed   :  { %v2011_v49 = vld.sshfl [vmem:[#allocation1] sm:$0xff pattern:$0x73625140]  ;;  %v2012_v39 = vld.sshfl [vmem:[#allocation1 + $0x8] sm:$0xff pattern:$0x73625140] }
 0x1ee   :  { %v2042_v56 = vsel %vm517_vm1, %v2013_v4, 0  ;;  %v2044_v57 = vsel %vm517_vm1, %v2014_v5, 0  ;;  %v2038_v58 = vsel %vm517_vm1, %v2011_v49, 0  ;;  %v2040_v63 = vsel %vm517_vm1, %v2012_v39, 0 }
 0x1f2   :  { %v1365_v25 = vpop.f32.mrf.mxu2  ;;  %v1378_v26 = vpop.f32.mrf.mxu3 }
 0x1f3   :  { %v1475_v43 = vpop.f32.mrf.mxu0  ;;  %v1488_v44 = vpop.f32.mrf.mxu1 }
 0x1f4   :  { %v3962_v13 = vadd.f32 %v1475_v43, %v3852_v21  ;;  %v3965_v14 = vadd.f32 %v1488_v44, %v3855_v22  ;;  %v3205_v21 = vld [vmem:[%s4312_s3 + $0xb8] sm:$0xff] }
 0x1f5   :  { %2010 = vst [vmem:[#allocation1 + $0x20] ss:$4 sm:$0xff] %v3205_v21 }
 0x1f6   :  { %3206 = vmatmul.msk.bf16.vlgmr.msra.gmra.mxu0 %vm78_vm2, %v3959_v55  ;;  %3207 = vmatmul.msk.bf16.vlgmr.msra.gmra.mxu1 %vm78_vm2, %v3959_v55 }
 0x1f7   :  { %3208 = vmatmul.msk.bf16.vlgmr.msra.gmra.mxu2 %vm78_vm2, %v3959_v55  ;;  %3209 = vmatmul.msk.bf16.vlgmr.msra.gmra.mxu3 %vm78_vm2, %v3959_v55 }
 0x1f8   :  { %2191 = vmatpush.bf16.msra.mxu2 %v2042_v56  ;;  %2204 = vmatpush.bf16.msra.mxu3 %v2044_v57 }
 0x1f9   :  { %2165 = vmatpush.bf16.msra.mxu0 %v2038_v58  ;;  %2178 = vmatpush.bf16.msra.mxu1 %v2040_v63 }
 0x1fa   :  { %v1501_v22 = vpop.f32.mrf.mxu2  ;;  %v1514_v0 = vpop.f32.mrf.mxu3 }
 0x1fb   :  { %v3983_v1 = vadd.f32 %v1501_v22, %v3873_v29  ;;  %v3986_v9 = vadd.f32 %v1514_v0, %v3876_v32  ;;  %v1477_v2 = vpop.f32.mrf.mxu0  ;;  %v1490_v59 = vpop.f32.mrf.mxu1 }
 0x1fc   :  { %v2017_v8 = vld.sshfl [vmem:[#allocation1 + $0x30] sm:$0xff pattern:$0x73625140]  ;;  %v2018_v16 = vld.sshfl [vmem:[#allocation1 + $0x38] sm:$0xff pattern:$0x73625140] }
 0x1fd   :  { %v2015_v47 = vld.sshfl [vmem:[#allocation1 + $0x20] sm:$0xff pattern:$0x73625140]  ;;  %v2016_v15 = vld.sshfl [vmem:[#allocation1 + $0x28] sm:$0xff pattern:$0x73625140] }
 0x1fe   :  { %v2050_v29 = vsel %vm517_vm1, %v2017_v8, 0  ;;  %v2052_v32 = vsel %vm517_vm1, %v2018_v16, 0  ;;  %v2046_v20 = vsel %vm517_vm1, %v2015_v47, 0  ;;  %v2048_v23 = vsel %vm517_vm1, %v2016_v15, 0 }
 0x1ff   :  { %v2279_v47 = vld [vmem:[#allocation2 + $0x6] ss:$8 sm:$0xf] }
 0x202   :  { %v1503_v62 = vpop.f32.mrf.mxu2  ;;  %v1516_v7 = vpop.f32.mrf.mxu3 }
 0x203   :  { %v1527_v17 = vpop.f32.mrf.mxu0  ;;  %v1540_v12 = vpop.f32.mrf.mxu1 }
 0x204   :  { %v3989_v48 = vadd.f32 %v1527_v17, %v3879_v45  ;;  %v3992_v18 = vadd.f32 %v1540_v12, %v3882_v46  ;;  %v3222_v45 = vld [vmem:[%s4312_s3 + $0xc0] sm:$0xff] }
 0x205   :  { %2289 = vst [vmem:[#allocation1] ss:$4 sm:$0xff] %v3222_v45 }
 0x206   :  { %3210 = vmatmul.msk.bf16.vlgmr.msrb.gmra.mxu0 %vm78_vm2, %v3959_v55  ;;  %3211 = vmatmul.msk.bf16.vlgmr.msrb.gmra.mxu1 %vm78_vm2, %v3959_v55 }
 0x207   :  { %3212 = vmatmul.msk.bf16.vlgmr.msrb.gmra.mxu2 %vm78_vm2, %v3959_v55  ;;  %3213 = vmatmul.msk.bf16.vlgmr.msrb.gmra.mxu3 %vm78_vm2, %v3959_v55 }
 0x208   :  { %2243 = vmatpush.bf16.msrb.mxu2 %v2050_v29  ;;  %2256 = vmatpush.bf16.msrb.mxu3 %v2052_v32 }
 0x209   :  { %2217 = vmatpush.bf16.msrb.mxu0 %v2046_v20  ;;  %2230 = vmatpush.bf16.msrb.mxu1 %v2048_v23 }
 0x20a   :  { %v1553_v46 = vpop.f32.mrf.mxu2  ;;  %v1566_v24 = vpop.f32.mrf.mxu3 }
 0x20b   :  { %v4010_v27 = vadd.f32 %v1553_v46, %v3900_v54  ;;  %v4013_v10 = vadd.f32 %v1566_v24, %v3903_v38  ;;  %v1529_v11 = vpop.f32.mrf.mxu0  ;;  %v1542_v33 = vpop.f32.mrf.mxu1 }
 0x20c   :  { %v2295_v35 = vld.sshfl [vmem:[#allocation1 + $0x10] sm:$0xff pattern:$0x73625140]  ;;  %v2296_v52 = vld.sshfl [vmem:[#allocation1 + $0x18] sm:$0xff pattern:$0x73625140] }
 0x20d   :  { %v2293_v40 = vld.sshfl [vmem:[#allocation1] sm:$0xff pattern:$0x73625140]  ;;  %v2294_v31 = vld.sshfl [vmem:[#allocation1 + $0x8] sm:$0xff pattern:$0x73625140] }
 0x20e   :  { %v2320_v54 = vsel %vm517_vm1, %v2295_v35, 0  ;;  %v2322_v38 = vsel %vm517_vm1, %v2296_v52, 0  ;;  %v2316_v42 = vsel %vm517_vm1, %v2293_v40, 0  ;;  %v2318_v25 = vsel %vm517_vm1, %v2294_v31, 0 }
 0x212   :  { %v1555_v60 = vpop.f32.mrf.mxu2  ;;  %v1568_v61 = vpop.f32.mrf.mxu3 }
 0x213   :  { %v1579_v53 = vpop.f32.mrf.mxu0  ;;  %v1592_v36 = vpop.f32.mrf.mxu1 }
 0x214   :  { %v4016_v19 = vadd.f32 %v1579_v53, %v3906_v3  ;;  %v4019_v41 = vadd.f32 %v1592_v36, %v3909_v6  ;;  %v3223_v3 = vld [vmem:[%s4312_s3 + $0xc8] sm:$0xff] }
 0x215   :  { %2292 = vst [vmem:[#allocation1 + $0x20] ss:$4 sm:$0xff] %v3223_v3 }
 0x216   :  { %3214 = vmatmul.msk.bf16.vlgmr.msra.gmra.mxu0 %vm78_vm2, %v3959_v55  ;;  %3215 = vmatmul.msk.bf16.vlgmr.msra.gmra.mxu1 %vm78_vm2, %v3959_v55 }
 0x217   :  { %3216 = vmatmul.msk.bf16.vlgmr.msra.gmra.mxu2 %vm78_vm2, %v3959_v55  ;;  %3217 = vmatmul.msk.bf16.vlgmr.msra.gmra.mxu3 %vm78_vm2, %v3959_v55 }
 0x218   :  { %2381 = vmatpush.bf16.msra.mxu2 %v2320_v54  ;;  %2394 = vmatpush.bf16.msra.mxu3 %v2322_v38 }
 0x219   :  { %2355 = vmatpush.bf16.msra.mxu0 %v2316_v42  ;;  %2368 = vmatpush.bf16.msra.mxu1 %v2318_v25 }
 0x21a   :  { %v1605_v6 = vpop.f32.mrf.mxu2  ;;  %v1618_v26 = vpop.f32.mrf.mxu3 }
 0x21b   :  { %v4037_v4 = vadd.f32 %v1605_v6, %v3927_v50  ;;  %v4040_v5 = vadd.f32 %v1618_v26, %v3930_v51  ;;  %v1581_v43 = vpop.f32.mrf.mxu0  ;;  %v1594_v44 = vpop.f32.mrf.mxu1 }
 0x21c   :  { %v2299_v56 = vld.sshfl [vmem:[#allocation1 + $0x30] sm:$0xff pattern:$0x73625140]  ;;  %v2300_v57 = vld.sshfl [vmem:[#allocation1 + $0x38] sm:$0xff pattern:$0x73625140] }
 0x21d   :  { %v2297_v21 = vld.sshfl [vmem:[#allocation1 + $0x20] sm:$0xff pattern:$0x73625140]  ;;  %v2298_v22 = vld.sshfl [vmem:[#allocation1 + $0x28] sm:$0xff pattern:$0x73625140] }
 0x21e   :  { %v2328_v50 = vsel %vm517_vm1, %v2299_v56, 0  ;;  %v2330_v51 = vsel %vm517_vm1, %v2300_v57, 0  ;;  %v2324_v59 = vsel %vm517_vm1, %v2297_v21, 0  ;;  %v2326_v62 = vsel %vm517_vm1, %v2298_v22, 0 }
 0x222   :  { %v1607_v49 = vpop.f32.mrf.mxu2  ;;  %v1620_v39 = vpop.f32.mrf.mxu3 }
 0x223   :  { %v1631_v58 = vpop.f32.mrf.mxu0  ;;  %v1644_v63 = vpop.f32.mrf.mxu1 }
 0x224   :  { %v4043_v0 = vadd.f32 %v1631_v58, %v3933_v28  ;;  %v4046_v2 = vadd.f32 %v1644_v63, %v3936_v34  ;;  %v3224_v28 = vld [vmem:[%s4312_s3 + $0xd0] sm:$0xff] }
 0x225   :  { %2302 = vst [vmem:[#allocation1] ss:$4 sm:$0xff] %v3224_v28 }
 0x226   :  { %3218 = vmatmul.msk.bf16.vlgmr.msrb.gmra.mxu0 %vm78_vm2, %v3959_v55  ;;  %3219 = vmatmul.msk.bf16.vlgmr.msrb.gmra.mxu1 %vm78_vm2, %v3959_v55 }
 0x227   :  { %3220 = vmatmul.msk.bf16.vlgmr.msrb.gmra.mxu2 %vm78_vm2, %v3959_v55  ;;  %3221 = vmatmul.msk.bf16.vlgmr.msrb.gmra.mxu3 %vm78_vm2, %v3959_v55  ;;  %v2280_v55 = vld [vmem:[#allocation2 + $0x6] ss:$8 sm:$0xf0] }
 0x228   :  { %2433 = vmatpush.bf16.msrb.mxu2 %v2328_v50  ;;  %2446 = vmatpush.bf16.msrb.mxu3 %v2330_v51  ;;  %v2281_v15 = vor.u32 %v2280_v55, %v2279_v47 }
 0x229   :  { %2407 = vmatpush.bf16.msrb.mxu0 %v2324_v59  ;;  %2420 = vmatpush.bf16.msrb.mxu1 %v2326_v62 }
 0x22a   :  { %v1657_v34 = vpop.f32.mrf.mxu2  ;;  %v1670_v7 = vpop.f32.mrf.mxu3  ;;  %v4069_v33 = vpack.c.bf16 %v2281_v15, %v2281_v15 }
 0x22b   :  { %v4064_v8 = vadd.f32 %v1657_v34, %v3954_v37  ;;  %v4067_v16 = vadd.f32 %v1670_v7, %v3957_v30  ;;  %v1633_v17 = vpop.f32.mrf.mxu0  ;;  %v1646_v12 = vpop.f32.mrf.mxu1 }
 0x22c   :  { %v2307_v20 = vld.sshfl [vmem:[#allocation1 + $0x10] sm:$0xff pattern:$0x73625140]  ;;  %v2308_v23 = vld.sshfl [vmem:[#allocation1 + $0x18] sm:$0xff pattern:$0x73625140] }
 0x22d   :  { %v2305_v24 = vld.sshfl [vmem:[#allocation1] sm:$0xff pattern:$0x73625140]  ;;  %v2306_v11 = vld.sshfl [vmem:[#allocation1 + $0x8] sm:$0xff pattern:$0x73625140] }
 0x22e   :  { %v2336_v60 = vsel %vm517_vm1, %v2307_v20, 0  ;;  %v2338_v61 = vsel %vm517_vm1, %v2308_v23, 0  ;;  %v2332_v35 = vsel %vm517_vm1, %v2305_v24, 0  ;;  %v2334_v52 = vsel %vm517_vm1, %v2306_v11, 0 }
 0x232   :  { %v1659_v29 = vpop.f32.mrf.mxu2  ;;  %v1672_v32 = vpop.f32.mrf.mxu3 }
 0x233   :  { %v1769_v45 = vpop.f32.mrf.mxu0  ;;  %v1782_v46 = vpop.f32.mrf.mxu1 }
 0x234   :  { %v4072_v37 = vadd.f32 %v1769_v45, %v3962_v13  ;;  %v4075_v30 = vadd.f32 %v1782_v46, %v3965_v14  ;;  %v3225_v13 = vld [vmem:[%s4312_s3 + $0xd8] sm:$0xff] }
 0x235   :  { %2304 = vst [vmem:[#allocation1 + $0x20] ss:$4 sm:$0xff] %v3225_v13 }
 0x236   :  { %3226 = vmatmul.msk.bf16.vlgmr.msra.gmra.mxu0 %vm78_vm2, %v4069_v33  ;;  %3227 = vmatmul.msk.bf16.vlgmr.msra.gmra.mxu1 %vm78_vm2, %v4069_v33 }
 0x237   :  { %3228 = vmatmul.msk.bf16.vlgmr.msra.gmra.mxu2 %vm78_vm2, %v4069_v33  ;;  %3229 = vmatmul.msk.bf16.vlgmr.msra.gmra.mxu3 %vm78_vm2, %v4069_v33 }
 0x238   :  { %2485 = vmatpush.bf16.msra.mxu2 %v2336_v60  ;;  %2498 = vmatpush.bf16.msra.mxu3 %v2338_v61 }
 0x239   :  { %2459 = vmatpush.bf16.msra.mxu0 %v2332_v35  ;;  %2472 = vmatpush.bf16.msra.mxu1 %v2334_v52 }
 0x23a   :  { %v1795_v14 = vpop.f32.mrf.mxu2  ;;  %v1808_v53 = vpop.f32.mrf.mxu3 }
 0x23b   :  { %v4093_v36 = vadd.f32 %v1795_v14, %v3983_v1  ;;  %v4096_v40 = vadd.f32 %v1808_v53, %v3986_v9  ;;  %v1771_v31 = vpop.f32.mrf.mxu0  ;;  %v1784_v54 = vpop.f32.mrf.mxu1 }
 0x23c   :  { %v2311_v25 = vld.sshfl [vmem:[#allocation1 + $0x30] sm:$0xff pattern:$0x73625140]  ;;  %v2312_v3 = vld.sshfl [vmem:[#allocation1 + $0x38] sm:$0xff pattern:$0x73625140] }
 0x23d   :  { %v2309_v43 = vld.sshfl [vmem:[#allocation1 + $0x20] sm:$0xff pattern:$0x73625140]  ;;  %v2310_v44 = vld.sshfl [vmem:[#allocation1 + $0x28] sm:$0xff pattern:$0x73625140] }
 0x23e   :  { %v2344_v1 = vsel %vm517_vm1, %v2311_v25, 0  ;;  %v2346_v9 = vsel %vm517_vm1, %v2312_v3, 0  ;;  %v2340_v56 = vsel %vm517_vm1, %v2309_v43, 0  ;;  %v2342_v57 = vsel %vm517_vm1, %v2310_v44, 0 }
 0x23f   :  { %v2573_v43 = vld [vmem:[#allocation2 + $0x7] ss:$8 sm:$0xf] }
 0x242   :  { %v1797_v38 = vpop.f32.mrf.mxu2  ;;  %v1810_v42 = vpop.f32.mrf.mxu3 }
 0x243   :  { %v1821_v6 = vpop.f32.mrf.mxu0  ;;  %v1834_v26 = vpop.f32.mrf.mxu1 }
 0x244   :  { %v4099_v49 = vadd.f32 %v1821_v6, %v3989_v48  ;;  %v4102_v39 = vadd.f32 %v1834_v26, %v3992_v18  ;;  %v3242_v48 = vld [vmem:[%s4312_s3 + $0xe0] sm:$0xff] }
 0x245   :  { %2583 = vst [vmem:[#allocation1] ss:$4 sm:$0xff] %v3242_v48 }
 0x246   :  { %3230 = vmatmul.msk.bf16.vlgmr.msrb.gmra.mxu0 %vm78_vm2, %v4069_v33  ;;  %3231 = vmatmul.msk.bf16.vlgmr.msrb.gmra.mxu1 %vm78_vm2, %v4069_v33 }
 0x247   :  { %3232 = vmatmul.msk.bf16.vlgmr.msrb.gmra.mxu2 %vm78_vm2, %v4069_v33  ;;  %3233 = vmatmul.msk.bf16.vlgmr.msrb.gmra.mxu3 %vm78_vm2, %v4069_v33 }
 0x248   :  { %2537 = vmatpush.bf16.msrb.mxu2 %v2344_v1  ;;  %2550 = vmatpush.bf16.msrb.mxu3 %v2346_v9 }
 0x249   :  { %2511 = vmatpush.bf16.msrb.mxu0 %v2340_v56  ;;  %2524 = vmatpush.bf16.msrb.mxu1 %v2342_v57 }
 0x24a   :  { %v1847_v18 = vpop.f32.mrf.mxu2  ;;  %v1860_v58 = vpop.f32.mrf.mxu3 }
 0x24b   :  { %v4120_v63 = vadd.f32 %v1847_v18, %v4010_v27  ;;  %v4123_v21 = vadd.f32 %v1860_v58, %v4013_v10  ;;  %v1823_v22 = vpop.f32.mrf.mxu0  ;;  %v1836_v50 = vpop.f32.mrf.mxu1 }
 0x24c   :  { %v2589_v62 = vld.sshfl [vmem:[#allocation1 + $0x10] sm:$0xff pattern:$0x73625140]  ;;  %v2590_v28 = vld.sshfl [vmem:[#allocation1 + $0x18] sm:$0xff pattern:$0x73625140] }
 0x24d   :  { %v2587_v17 = vld.sshfl [vmem:[#allocation1] sm:$0xff pattern:$0x73625140]  ;;  %v2588_v12 = vld.sshfl [vmem:[#allocation1 + $0x8] sm:$0xff pattern:$0x73625140] }
 0x24e   :  { %v2614_v27 = vsel %vm517_vm1, %v2589_v62, 0  ;;  %v2616_v10 = vsel %vm517_vm1, %v2590_v28, 0  ;;  %v2610_v15 = vsel %vm517_vm1, %v2587_v17, 0  ;;  %v2612_v29 = vsel %vm517_vm1, %v2588_v12, 0 }
 0x252   :  { %v1849_v51 = vpop.f32.mrf.mxu2  ;;  %v1862_v59 = vpop.f32.mrf.mxu3 }
 0x253   :  { %v1873_v34 = vpop.f32.mrf.mxu0  ;;  %v1886_v7 = vpop.f32.mrf.mxu1 }
 0x254   :  { %v4126_v55 = vadd.f32 %v1873_v34, %v4016_v19  ;;  %v4129_v47 = vadd.f32 %v1886_v7, %v4019_v41  ;;  %v3243_v19 = vld [vmem:[%s4312_s3 + $0xe8] sm:$0xff] }
 0x255   :  { %2586 = vst [vmem:[#allocation1 + $0x20] ss:$4 sm:$0xff] %v3243_v19 }
 0x256   :  { %3234 = vmatmul.msk.bf16.vlgmr.msra.gmra.mxu0 %vm78_vm2, %v4069_v33  ;;  %3235 = vmatmul.msk.bf16.vlgmr.msra.gmra.mxu1 %vm78_vm2, %v4069_v33 }
 0x257   :  { %3236 = vmatmul.msk.bf16.vlgmr.msra.gmra.mxu2 %vm78_vm2, %v4069_v33  ;;  %3237 = vmatmul.msk.bf16.vlgmr.msra.gmra.mxu3 %vm78_vm2, %v4069_v33 }
 0x258   :  { %2675 = vmatpush.bf16.msra.mxu2 %v2614_v27  ;;  %2688 = vmatpush.bf16.msra.mxu3 %v2616_v10 }
 0x259   :  { %2649 = vmatpush.bf16.msra.mxu0 %v2610_v15  ;;  %2662 = vmatpush.bf16.msra.mxu1 %v2612_v29 }
 0x25a   :  { %v1899_v41 = vpop.f32.mrf.mxu2  ;;  %v1912_v32 = vpop.f32.mrf.mxu3 }
 0x25b   :  { %v4147_v20 = vadd.f32 %v1899_v41, %v4037_v4  ;;  %v4150_v23 = vadd.f32 %v1912_v32, %v4040_v5  ;;  %v1875_v45 = vpop.f32.mrf.mxu0  ;;  %v1888_v46 = vpop.f32.mrf.mxu1 }
 0x25c   :  { %v2593_v60 = vld.sshfl [vmem:[#allocation1 + $0x30] sm:$0xff pattern:$0x73625140]  ;;  %v2594_v61 = vld.sshfl [vmem:[#allocation1 + $0x38] sm:$0xff pattern:$0x73625140] }
 0x25d   :  { %v2591_v13 = vld.sshfl [vmem:[#allocation1 + $0x20] sm:$0xff pattern:$0x73625140]  ;;  %v2592_v14 = vld.sshfl [vmem:[#allocation1 + $0x28] sm:$0xff pattern:$0x73625140] }
 0x25e   :  { %v2622_v4 = vsel %vm517_vm1, %v2593_v60, 0  ;;  %v2624_v5 = vsel %vm517_vm1, %v2594_v61, 0  ;;  %v2618_v54 = vsel %vm517_vm1, %v2591_v13, 0  ;;  %v2620_v38 = vsel %vm517_vm1, %v2592_v14, 0 }
 0x262   :  { %v1901_v24 = vpop.f32.mrf.mxu2  ;;  %v1914_v11 = vpop.f32.mrf.mxu3 }
 0x263   :  { %v1925_v35 = vpop.f32.mrf.mxu0  ;;  %v1938_v52 = vpop.f32.mrf.mxu1 }
 0x264   :  { %v4153_v53 = vadd.f32 %v1925_v35, %v4043_v0  ;;  %v4156_v31 = vadd.f32 %v1938_v52, %v4046_v2  ;;  %v3244_v0 = vld [vmem:[%s4312_s3 + $0xf0] sm:$0xff] }
 0x265   :  { %2596 = vst [vmem:[#allocation1] ss:$4 sm:$0xff] %v3244_v0 }
 0x266   :  { %3238 = vmatmul.msk.bf16.vlgmr.msrb.gmra.mxu0 %vm78_vm2, %v4069_v33  ;;  %3239 = vmatmul.msk.bf16.vlgmr.msrb.gmra.mxu1 %vm78_vm2, %v4069_v33 }
 0x267   :  { %3240 = vmatmul.msk.bf16.vlgmr.msrb.gmra.mxu2 %vm78_vm2, %v4069_v33  ;;  %3241 = vmatmul.msk.bf16.vlgmr.msrb.gmra.mxu3 %vm78_vm2, %v4069_v33  ;;  %v2574_v33 = vld [vmem:[#allocation2 + $0x7] ss:$8 sm:$0xf0] }
 0x268   :  { %2727 = vmatpush.bf16.msrb.mxu2 %v2622_v4  ;;  %2740 = vmatpush.bf16.msrb.mxu3 %v2624_v5  ;;  %v2575_v44 = vor.u32 %v2574_v33, %v2573_v43 }
 0x269   :  { %2701 = vmatpush.bf16.msrb.mxu0 %v2618_v54  ;;  %2714 = vmatpush.bf16.msrb.mxu1 %v2620_v38 }
 0x26a   :  { %v1951_v2 = vpop.f32.mrf.mxu2  ;;  %v1964_v42 = vpop.f32.mrf.mxu3  ;;  %v4179_v50 = vpack.c.bf16 %v2575_v44, %v2575_v44 }
 0x26b   :  { %v4174_v25 = vadd.f32 %v1951_v2, %v4064_v8  ;;  %v4177_v3 = vadd.f32 %v1964_v42, %v4067_v16  ;;  %v1927_v6 = vpop.f32.mrf.mxu0  ;;  %v1940_v26 = vpop.f32.mrf.mxu1 }
 0x26c   :  { %v2601_v56 = vld.sshfl [vmem:[#allocation1 + $0x10] sm:$0xff pattern:$0x73625140]  ;;  %v2602_v57 = vld.sshfl [vmem:[#allocation1 + $0x18] sm:$0xff pattern:$0x73625140] }
 0x26d   :  { %v2599_v58 = vld.sshfl [vmem:[#allocation1] sm:$0xff pattern:$0x73625140]  ;;  %v2600_v22 = vld.sshfl [vmem:[#allocation1 + $0x8] sm:$0xff pattern:$0x73625140] }
 0x26e   :  { %v2630_v51 = vsel %vm517_vm1, %v2601_v56, 0  ;;  %v2632_v59 = vsel %vm517_vm1, %v2602_v57, 0  ;;  %v2626_v62 = vsel %vm517_vm1, %v2599_v58, 0  ;;  %v2628_v28 = vsel %vm517_vm1, %v2600_v22, 0 }
 0x272   :  { %v1953_v1 = vpop.f32.mrf.mxu2  ;;  %v1966_v9 = vpop.f32.mrf.mxu3 }
 0x273   :  { %v2063_v48 = vpop.f32.mrf.mxu0  ;;  %v2076_v18 = vpop.f32.mrf.mxu1 }
 0x274   :  { %v4182_v8 = vadd.f32 %v2063_v48, %v4072_v37  ;;  %v4185_v16 = vadd.f32 %v2076_v18, %v4075_v30  ;;  %v3245_v37 = vld [vmem:[%s4312_s3 + $0xf8] sm:$0xff]  ;;  %s3326_s3 = smov [#allocation3]  }
 0x275   :  { %2598 = vst [vmem:[#allocation1 + $0x20] ss:$4 sm:$0xff] %v3245_v37  ;;  %s2903_s30 = sshll.u32 %s3326_s3, 4  ;;  %s2904_s30 = int_to_ptr.vmem [resolvable:$true] %s2903_s30 }
 0x276   :  { %3246 = vmatmul.msk.bf16.vlgmr.msra.gmra.mxu0 %vm78_vm2, %v4179_v50  ;;  %3247 = vmatmul.msk.bf16.vlgmr.msra.gmra.mxu1 %vm78_vm2, %v4179_v50 }
 0x277   :  { %3248 = vmatmul.msk.bf16.vlgmr.msra.gmra.mxu2 %vm78_vm2, %v4179_v50  ;;  %3249 = vmatmul.msk.bf16.vlgmr.msra.gmra.mxu3 %vm78_vm2, %v4179_v50 }
 0x278   :  { %2779 = vmatpush.bf16.msra.mxu2 %v2630_v51  ;;  %2792 = vmatpush.bf16.msra.mxu3 %v2632_v59 }
 0x279   :  { %2753 = vmatpush.bf16.msra.mxu0 %v2626_v62  ;;  %2766 = vmatpush.bf16.msra.mxu1 %v2628_v28 }
 0x27a   :  { %v2089_v30 = vpop.f32.mrf.mxu2  ;;  %v2102_v34 = vpop.f32.mrf.mxu3 }
 0x27b   :  { %v4203_v7 = vadd.f32 %v2089_v30, %v4093_v36  ;;  %v4206_v17 = vadd.f32 %v2102_v34, %v4096_v40  ;;  %v2065_v12 = vpop.f32.mrf.mxu0  ;;  %v2078_v27 = vpop.f32.mrf.mxu1 }
 0x27c   :  { %v2605_v29 = vld.sshfl [vmem:[#allocation1 + $0x30] sm:$0xff pattern:$0x73625140]  ;;  %v2606_v19 = vld.sshfl [vmem:[#allocation1 + $0x38] sm:$0xff pattern:$0x73625140] }
 0x27d   :  { %v2603_v45 = vld.sshfl [vmem:[#allocation1 + $0x20] sm:$0xff pattern:$0x73625140]  ;;  %v2604_v46 = vld.sshfl [vmem:[#allocation1 + $0x28] sm:$0xff pattern:$0x73625140] }
 0x27e   :  { %v2638_v36 = vsel %vm517_vm1, %v2605_v29, 0  ;;  %v2640_v40 = vsel %vm517_vm1, %v2606_v19, 0  ;;  %v2634_v60 = vsel %vm517_vm1, %v2603_v45, 0  ;;  %v2636_v61 = vsel %vm517_vm1, %v2604_v46, 0 }
 0x282   :  { %v2091_v10 = vpop.f32.mrf.mxu2  ;;  %v2104_v15 = vpop.f32.mrf.mxu3 }
 0x283   :  { %v2115_v41 = vpop.f32.mrf.mxu0  ;;  %v2128_v32 = vpop.f32.mrf.mxu1 }
 0x284   :  { %v4209_v24 = vadd.f32 %v2115_v41, %v4099_v49  ;;  %v4212_v11 = vadd.f32 %v2128_v32, %v4102_v39 }
 0x286   :  { %3250 = vmatmul.msk.bf16.vlgmr.msrb.gmra.mxu0 %vm78_vm2, %v4179_v50  ;;  %3251 = vmatmul.msk.bf16.vlgmr.msrb.gmra.mxu1 %vm78_vm2, %v4179_v50 }
 0x287   :  { %3252 = vmatmul.msk.bf16.vlgmr.msrb.gmra.mxu2 %vm78_vm2, %v4179_v50  ;;  %3253 = vmatmul.msk.bf16.vlgmr.msrb.gmra.mxu3 %vm78_vm2, %v4179_v50 }
 0x288   :  { %2831 = vmatpush.bf16.msrb.mxu2 %v2638_v36  ;;  %2844 = vmatpush.bf16.msrb.mxu3 %v2640_v40 }
 0x289   :  { %2805 = vmatpush.bf16.msrb.mxu0 %v2634_v60  ;;  %2818 = vmatpush.bf16.msrb.mxu1 %v2636_v61 }
 0x28a   :  { %v2141_v49 = vpop.f32.mrf.mxu2  ;;  %v2154_v39 = vpop.f32.mrf.mxu3 }
 0x28b   :  { %v4227_v35 = vadd.f32 %v2141_v49, %v4120_v63  ;;  %v4230_v52 = vadd.f32 %v2154_v39, %v4123_v21  ;;  %v2117_v13 = vpop.f32.mrf.mxu0  ;;  %v2130_v14 = vpop.f32.mrf.mxu1 }
 0x292   :  { %v2143_v4 = vpop.f32.mrf.mxu2  ;;  %v2156_v5 = vpop.f32.mrf.mxu3 }
 0x293   :  { %v2167_v54 = vpop.f32.mrf.mxu0  ;;  %v2180_v38 = vpop.f32.mrf.mxu1 }
 0x294   :  { %v4233_v0 = vadd.f32 %v2167_v54, %v4126_v55  ;;  %v4236_v2 = vadd.f32 %v2180_v38, %v4129_v47 }
 0x296   :  { %3254 = vmatmul.msk.bf16.vlgmr.msra.gmra.mxu0 %vm78_vm2, %v4179_v50  ;;  %3255 = vmatmul.msk.bf16.vlgmr.msra.gmra.mxu1 %vm78_vm2, %v4179_v50 }
 0x297   :  { %3256 = vmatmul.msk.bf16.vlgmr.msra.gmra.mxu2 %vm78_vm2, %v4179_v50  ;;  %3257 = vmatmul.msk.bf16.vlgmr.msra.gmra.mxu3 %vm78_vm2, %v4179_v50 }
 0x29a   :  { %v2193_v63 = vpop.f32.mrf.mxu2  ;;  %v2206_v21 = vpop.f32.mrf.mxu3 }
 0x29b   :  { %v4247_v55 = vadd.f32 %v2193_v63, %v4147_v20  ;;  %v4250_v47 = vadd.f32 %v2206_v21, %v4150_v23  ;;  %v2169_v42 = vpop.f32.mrf.mxu0  ;;  %v2182_v6 = vpop.f32.mrf.mxu1 }
 0x2a2   :  { %v2195_v26 = vpop.f32.mrf.mxu2  ;;  %v2208_v33 = vpop.f32.mrf.mxu3 }
 0x2a3   :  { %v2219_v43 = vpop.f32.mrf.mxu0  ;;  %v2232_v44 = vpop.f32.mrf.mxu1 }
 0x2a4   :  { %v4253_v1 = vadd.f32 %v2219_v43, %v4153_v53  ;;  %v4256_v9 = vadd.f32 %v2232_v44, %v4156_v31 }
 0x2a6   :  { %3258 = vmatmul.msk.bf16.vlgmr.msrb.gmra.mxu0 %vm78_vm2, %v4179_v50  ;;  %3259 = vmatmul.msk.bf16.vlgmr.msrb.gmra.mxu1 %vm78_vm2, %v4179_v50 }
 0x2a7   :  { %3260 = vmatmul.msk.bf16.vlgmr.msrb.gmra.mxu2 %vm78_vm2, %v4179_v50  ;;  %3261 = vmatmul.msk.bf16.vlgmr.msrb.gmra.mxu3 %vm78_vm2, %v4179_v50 }
 0x2aa   :  { %v2245_v20 = vpop.f32.mrf.mxu2  ;;  %v2258_v23 = vpop.f32.mrf.mxu3 }
 0x2ab   :  { %v4267_v53 = vadd.f32 %v2245_v20, %v4174_v25  ;;  %v4270_v31 = vadd.f32 %v2258_v23, %v4177_v3  ;;  %v2221_v56 = vpop.f32.mrf.mxu0  ;;  %v2234_v57 = vpop.f32.mrf.mxu1 }
 0x2b2   :  { %v2247_v48 = vpop.f32.mrf.mxu2  ;;  %v2260_v18 = vpop.f32.mrf.mxu3 }
 0x2b3   :  { %v2357_v58 = vpop.f32.mrf.mxu0  ;;  %v2370_v22 = vpop.f32.mrf.mxu1 }
 0x2b4   :  { %v2556_v4 = vadd.f32 %v2357_v58, %v4182_v8  ;;  %v2557_v5 = vadd.f32 %v2370_v22, %v4185_v16 }
 0x2ba   :  { %v2383_v51 = vpop.f32.mrf.mxu2  ;;  %v2396_v59 = vpop.f32.mrf.mxu3 }
 0x2bb   :  { %v2359_v62 = vpop.f32.mrf.mxu0  ;;  %v2372_v28 = vpop.f32.mrf.mxu1  ;;  %v2558_v44 = vadd.f32 %v2383_v51, %v4203_v7  ;;  %v2559_v20 = vadd.f32 %v2396_v59, %v4206_v17 }
 0x2c2   :  { %v2385_v37 = vpop.f32.mrf.mxu2  ;;  %v2398_v50 = vpop.f32.mrf.mxu3 }
 0x2c3   :  { %v2409_v30 = vpop.f32.mrf.mxu0  ;;  %v2422_v34 = vpop.f32.mrf.mxu1 }
 0x2c4   :  { %v2560_v62 = vadd.f32 %v2409_v30, %v4209_v24  ;;  %v2561_v28 = vadd.f32 %v2422_v34, %v4212_v11 }
 0x2ca   :  { %v2435_v12 = vpop.f32.mrf.mxu2  ;;  %v2448_v25 = vpop.f32.mrf.mxu3 }
 0x2cb   :  { %v2411_v27 = vpop.f32.mrf.mxu0  ;;  %v2424_v10 = vpop.f32.mrf.mxu1 }
 0x2d2   :  { %v2437_v3 = vpop.f32.mrf.mxu2  ;;  %v2450_v15 = vpop.f32.mrf.mxu3 }
 0x2d3   :  { %v2461_v29 = vpop.f32.mrf.mxu0  ;;  %v2474_v19 = vpop.f32.mrf.mxu1  ;;  %v2562_v15 = vadd.f32 %v2435_v12, %v4227_v35 }
 0x2da   :  { %v4272_v41 = vpop.f32.mrf.mxu2  ;;  %v4274_v32 = vpop.f32.mrf.mxu3 }
 0x2db   :  { %v2463_v45 = vpop.f32.mrf.mxu0  ;;  %v2476_v46 = vpop.f32.mrf.mxu1 }
 0x2dc   :  { %v2563_v45 = vadd.f32 %v2448_v25, %v4230_v52 }
 0x2e2   :  { %v2489_v36 = vpop.f32.mrf.mxu2  ;;  %v2502_v40 = vpop.f32.mrf.mxu3 }
 0x2e3   :  { %v4276_v60 = vpop.f32.mrf.mxu0  ;;  %v4278_v61 = vpop.f32.mrf.mxu1 }
 0x2ea   :  { %v4280_v49 = vpop.f32.mrf.mxu2  ;;  %v4282_v39 = vpop.f32.mrf.mxu3 }
 0x2eb   :  { %v2515_v13 = vpop.f32.mrf.mxu0  ;;  %v2528_v14 = vpop.f32.mrf.mxu1 }
 0x2f2   :  { %v2541_v54 = vpop.f32.mrf.mxu2  ;;  %v2554_v38 = vpop.f32.mrf.mxu3 }
 0x2f3   :  { %v2651_v63 = vpop.f32.mrf.mxu0  ;;  %v2664_v21 = vpop.f32.mrf.mxu1 }
 0x2f4   :  { %v2850_v42 = vadd.f32 %v2651_v63, %v2556_v4  ;;  %v2851_v6 = vadd.f32 %v2664_v21, %v2557_v5  ;;  %v2564_v4 = vadd.f32 %v2461_v29, %v4233_v0  ;;  %v2565_v5 = vadd.f32 %v2474_v19, %v4236_v2 }
 0x2f6   :  { %v2866_v26 = vmax.f32 %v2850_v42, 0.0  ;;  %v2867_v33 = vmax.f32 %v2851_v6, 0.0  ;;  %v2566_v6 = vadd.f32 %v4272_v41, %v4247_v55  ;;  %v2569_v55 = vadd.f32 %v4278_v61, %v4256_v9 }
 0x2f8   :  { %v2882_v43 = vpack.c.bf16 %v2867_v33, %v2866_v26  ;;  %v2567_v26 = vadd.f32 %v4274_v32, %v4250_v47 }
 0x2fa   :  { %2890 = vst [vmem:[#allocation3] sm:$0xff] %v2882_v43  ;;  %v2677_v23 = vpop.f32.mrf.mxu2  ;;  %v2690_v56 = vpop.f32.mrf.mxu3 }
 0x2fb   :  { %v2852_v57 = vadd.f32 %v2677_v23, %v2558_v44  ;;  %v2853_v8 = vadd.f32 %v2690_v56, %v2559_v20  ;;  %v2653_v48 = vpop.f32.mrf.mxu0  ;;  %v2666_v16 = vpop.f32.mrf.mxu1  ;;  %v2568_v56 = vadd.f32 %v4276_v60, %v4253_v1 }
 0x2fd   :  { %v2868_v18 = vmax.f32 %v2852_v57, 0.0  ;;  %v2869_v58 = vmax.f32 %v2853_v8, 0.0 }
 0x2ff   :  { %v2883_v22 = vpack.c.bf16 %v2869_v58, %v2868_v18 }
 0x301   :  { %2891 = vst [vmem:[#allocation3 + $0x8] sm:$0xff] %v2883_v22  ;;  %v2570_v22 = vadd.f32 %v4280_v49, %v4267_v53 }
 0x302   :  { %v2679_v37 = vpop.f32.mrf.mxu2  ;;  %v2692_v50 = vpop.f32.mrf.mxu3 }
 0x303   :  { %v2703_v7 = vpop.f32.mrf.mxu0  ;;  %v2716_v51 = vpop.f32.mrf.mxu1 }
 0x304   :  { %v2854_v17 = vadd.f32 %v2703_v7, %v2560_v62  ;;  %v2855_v59 = vadd.f32 %v2716_v51, %v2561_v28  ;;  %v2571_v62 = vadd.f32 %v4282_v39, %v4270_v31 }
 0x306   :  { %v2870_v27 = vmax.f32 %v2854_v17, 0.0  ;;  %v2871_v10 = vmax.f32 %v2855_v59, 0.0 }
 0x308   :  { %v2884_v3 = vpack.c.bf16 %v2871_v10, %v2870_v27 }
 0x30a   :  { %2892 = vst [vmem:[#allocation3 + $0x10] sm:$0xff] %v2884_v3  ;;  %v2729_v46 = vpop.f32.mrf.mxu2  ;;  %v2742_v36 = vpop.f32.mrf.mxu3 }
 0x30b   :  { %v2856_v40 = vadd.f32 %v2729_v46, %v2562_v15  ;;  %v2857_v24 = vadd.f32 %v2742_v36, %v2563_v45  ;;  %v2705_v30 = vpop.f32.mrf.mxu0  ;;  %v2718_v11 = vpop.f32.mrf.mxu1 }
 0x30d   :  { %v2872_v34 = vmax.f32 %v2856_v40, 0.0  ;;  %v2873_v13 = vmax.f32 %v2857_v24, 0.0 }
 0x30f   :  { %v2885_v14 = vpack.c.bf16 %v2873_v13, %v2872_v34 }
 0x311   :  { %2893 = vst [vmem:[#allocation3 + $0x18] sm:$0xff] %v2885_v14 }
 0x312   :  { %v2731_v54 = vpop.f32.mrf.mxu2  ;;  %v2744_v38 = vpop.f32.mrf.mxu3 }
 0x313   :  { %v2755_v35 = vpop.f32.mrf.mxu0  ;;  %v2768_v12 = vpop.f32.mrf.mxu1 }
 0x314   :  { %v2858_v52 = vadd.f32 %v2755_v35, %v2564_v4  ;;  %v2859_v25 = vadd.f32 %v2768_v12, %v2565_v5 }
 0x316   :  { %v2874_v63 = vmax.f32 %v2858_v52, 0.0  ;;  %v2875_v21 = vmax.f32 %v2859_v25, 0.0 }
 0x318   :  { %v2886_v42 = vpack.c.bf16 %v2875_v21, %v2874_v63 }
 0x31a   :  { %2894 = vst [vmem:[#allocation3 + $0x20] sm:$0xff] %v2886_v42  ;;  %v2781_v33 = vpop.f32.mrf.mxu2  ;;  %v2794_v0 = vpop.f32.mrf.mxu3 }
 0x31b   :  { %v2860_v29 = vadd.f32 %v2781_v33, %v2566_v6  ;;  %v2861_v2 = vadd.f32 %v2794_v0, %v2567_v26  ;;  %v2757_v19 = vpop.f32.mrf.mxu0  ;;  %v2770_v43 = vpop.f32.mrf.mxu1 }
 0x31d   :  { %v2876_v44 = vmax.f32 %v2860_v29, 0.0  ;;  %v2877_v20 = vmax.f32 %v2861_v2, 0.0 }
 0x31f   :  { %v2887_v23 = vpack.c.bf16 %v2877_v20, %v2876_v44 }
 0x321   :  { %2895 = vst [vmem:[#allocation3 + $0x28] sm:$0xff] %v2887_v23 }
 0x322   :  { %v2783_v41 = vpop.f32.mrf.mxu2  ;;  %v2796_v57 = vpop.f32.mrf.mxu3 }
 0x323   :  { %v2807_v47 = vpop.f32.mrf.mxu0  ;;  %v2820_v32 = vpop.f32.mrf.mxu1 }
 0x324   :  { %v2862_v8 = vadd.f32 %v2807_v47, %v2568_v56  ;;  %v2863_v48 = vadd.f32 %v2820_v32, %v2569_v55 }
 0x326   :  { %v2878_v16 = vmax.f32 %v2862_v8, 0.0  ;;  %v2879_v18 = vmax.f32 %v2863_v48, 0.0 }
 0x328   :  { %v2888_v58 = vpack.c.bf16 %v2879_v18, %v2878_v16 }
 0x32a   :  { %2896 = vst [vmem:[#allocation3 + $0x30] sm:$0xff] %v2888_v58  ;;  %v2833_v1 = vpop.f32.mrf.mxu2  ;;  %v2846_v60 = vpop.f32.mrf.mxu3 }
 0x32b   :  { %v2864_v28 = vadd.f32 %v2833_v1, %v2570_v22  ;;  %v2865_v9 = vadd.f32 %v2846_v60, %v2571_v62  ;;  %v2809_v61 = vpop.f32.mrf.mxu0  ;;  %v2822_v37 = vpop.f32.mrf.mxu1 }
 0x32d   :  { %v2880_v50 = vmax.f32 %v2864_v28, 0.0  ;;  %v2881_v7 = vmax.f32 %v2865_v9, 0.0 }
 0x32f   :  { %v2889_v51 = vpack.c.bf16 %v2881_v7, %v2880_v50 }
 0x331   :  { %2897 = vst [vmem:[#allocation3 + $0x38] sm:$0xff] %v2889_v51 }
 0x332   :  { %v2835_v53 = vpop.f32.mrf.mxu2  ;;  %v2848_v31 = vpop.f32.mrf.mxu3  ;;  %2908 = dma.vmem_to_hbm [thread:$0]  %s2904_s30, 1024, %s2906_s8, [#allocation4]  }
 0x333   :  { %3323 = dma.done.wait [#allocation4], 1024  }
 0x334   :  { %3324 = vsyncadd [#allocation4], 4294966272 }
 0x335   :  { %2913 = vsyncpa [#allocation4], 1 }

</bundles_post_ra>
